<compile_context>
chip_gen: v7x
topology: tpu7x:2x2x1
jax: 0.10.0
libtpu: 0.0.40
codegen_flags: <defaults>
</compile_context>

<pallas_src>
import functools

import jax
import jax.numpy as jnp
from jax import lax
from jax.experimental import pallas as pl
from jax.experimental.pallas import tpu as pltpu


# ------------------------------ Pallas kernel -------------------------------

def _inception_kernel(x_ref, w1_ref, b1_ref, w2a_ref, b2a_ref, w2b_ref, b2b_ref,
                      w3a_ref, b3a_ref, w3b_ref, b3b_ref, w4_ref, b4_ref,
                      o_ref, *, H, W):
    """Fused Inception block for one batch sample.

    x_ref  : (1, Cin, H*W)         channels on sublanes, pixels on lanes
    wX_ref : (Cout, K*K*Cin)       im2col-flattened weights (tap order ky,kx,cin)
    bX_ref : (Cout, 1)
    o_ref  : (1, c1+c2+c3+c4, H*W) channel-concatenated output
    """
    HW = H * W
    xc = x_ref[0]                                       # (Cin, H*W)

    # Flattened pixel index / column index (hoisted, reused by every tap mask).
    q = lax.broadcasted_iota(jnp.int32, (1, HW), 1)
    col = (q & (W - 1)) if (W & (W - 1)) == 0 else (q % W)

    def lane_roll(v, d):
        # result[:, p] = v[:, (p + d) % HW]  (d is a static Python int)
        d = d % HW
        if d == 0:
            return v
        return jnp.concatenate([v[:, d:], v[:, :d]], axis=1)

    def shift2d(v, dy, dx, fill):
        # v sampled at spatial offset (dy, dx); `fill` outside the image.
        shifted = lane_roll(v, dy * W + dx)
        valid = None
        if dy != 0:
            lo, hi = max(0, -dy) * W, (H - max(0, dy)) * W
            valid = (q >= lo) & (q < hi)
        if dx != 0:
            cmask = (col >= -dx) & (col < W - dx)
            valid = cmask if valid is None else (valid & cmask)
        if valid is None:                                # (dy, dx) == (0, 0)
            return v
        return jnp.where(valid, shifted, fill)

    def conv1x1(w_ref, b_ref, v):
        y = jnp.dot(w_ref[...], v, preferred_element_type=jnp.float32)
        return jnp.maximum(y + b_ref[...], 0.0)

    def conv_kxk(w_ref, b_ref, v, K):
        # im2col: one (Cout, K*K*Cin) @ (K*K*Cin, H*W) MXU matmul.
        r = (K - 1) // 2
        cols = jnp.concatenate(
            [shift2d(v, dy, dx, 0.0)
             for dy in range(-r, r + 1) for dx in range(-r, r + 1)], axis=0)
        y = jnp.dot(w_ref[...], cols, preferred_element_type=jnp.float32)
        return jnp.maximum(y + b_ref[...], 0.0)

    # branch 1: 1x1 conv + ReLU
    p1 = conv1x1(w1_ref, b1_ref, xc)

    # branch 2: 1x1 conv + ReLU -> 3x3 conv (pad 1) + ReLU
    p2 = conv_kxk(w2b_ref, b2b_ref, conv1x1(w2a_ref, b2a_ref, xc), 3)

    # branch 3: 1x1 conv + ReLU -> 5x5 conv (pad 2) + ReLU
    p3 = conv_kxk(w3b_ref, b3b_ref, conv1x1(w3a_ref, b3a_ref, xc), 5)

    # branch 4: 3x3 max-pool (stride 1, pad 1, -inf border) -> 1x1 conv + ReLU
    m = xc
    for dy in (-1, 0, 1):
        for dx in (-1, 0, 1):
            if dy == 0 and dx == 0:
                continue
            m = jnp.maximum(m, shift2d(xc, dy, dx, -jnp.inf))
    p4 = conv1x1(w4_ref, b4_ref, m)

    # channel concat: each branch written straight into its channel offsets.
    c1, c2, c3, c4 = p1.shape[0], p2.shape[0], p3.shape[0], p4.shape[0]
    o_ref[0, 0:c1, :] = p1.astype(o_ref.dtype)
    o_ref[0, c1:c1 + c2, :] = p2.astype(o_ref.dtype)
    o_ref[0, c1 + c2:c1 + c2 + c3, :] = p3.astype(o_ref.dtype)
    o_ref[0, c1 + c2 + c3:c1 + c2 + c3 + c4, :] = p4.astype(o_ref.dtype)


# --------------------------------- wrapper -----------------------------------

def inception_forward(x_nchw, p):
    """Fused Pallas Inception forward.  Input/output in NCHW (PyTorch conv.)."""
    N, Cin, H, W = x_nchw.shape
    HW = H * W

    def to_mm(w):                     # (K,K,Cin,Cout) -> (Cout, K*K*Cin)
        K1, K2, ci, co = w.shape
        return jnp.transpose(w, (3, 0, 1, 2)).reshape(co, K1 * K2 * ci)

    def to_col(b):                    # (1,Cout) -> (Cout,1)
        return jnp.reshape(b, (-1, 1))

    w1, b1 = to_mm(p["w1"]), to_col(p["b1"])
    w2a, b2a = to_mm(p["w2a"]), to_col(p["b2a"])
    w2b, b2b = to_mm(p["w2b"]), to_col(p["b2b"])
    w3a, b3a = to_mm(p["w3a"]), to_col(p["b3a"])
    w3b, b3b = to_mm(p["w3b"]), to_col(p["b3b"])
    w4, b4 = to_mm(p["w4"]), to_col(p["b4"])

    c1, c2, c3, c4 = w1.shape[0], w2b.shape[0], w3b.shape[0], w4.shape[0]
    ctot = c1 + c2 + c3 + c4

    x_flat = x_nchw.reshape(N, Cin, HW)      # free reshape, keeps NCHW order

    def full(a):                             # whole-array block, fixed index
        return pl.BlockSpec(a.shape, lambda n: (0,) * a.ndim)

    kern = functools.partial(_inception_kernel, H=H, W=W)
    out = pl.pallas_call(
        kern,
        out_shape=jax.ShapeDtypeStruct((N, ctot, HW), jnp.float32),
        grid=(N,),
        in_specs=[
            pl.BlockSpec((1, Cin, HW), lambda n: (n, 0, 0)),
            full(w1), full(b1), full(w2a), full(b2a), full(w2b), full(b2b),
            full(w3a), full(b3a), full(w3b), full(b3b), full(w4), full(b4),
        ],
        out_specs=pl.BlockSpec((1, ctot, HW), lambda n: (n, 0, 0)),
        compiler_params=pltpu.CompilerParams(
            dimension_semantics=("parallel",)),   # v7x: shard batch over 2 TCs
    )(x_flat, w1, b1, w2a, b2a, w2b, b2b, w3a, b3a, w3b, b3b, w4, b4)

    return out.reshape(N, ctot, H, W)            # free reshape -> NCHW


# ------------------------- pure-JAX reference --------------------------------

def inception_reference(x_nchw, p):
    x = jnp.transpose(x_nchw, (0, 2, 3, 1))      # NHWC

    def conv(xx, w, b, pad):
        y = lax.conv_general_dilated(
            xx, w, window_strides=(1, 1), padding=[(pad, pad), (pad, pad)],
            dimension_numbers=("NHWC", "HWIO", "NHWC"))
        return jax.nn.relu(y + b[0])

    x1 = conv(x, p["w1"], p["b1"], 0)
    x2 = conv(conv(x, p["w2a"], p["b2a"], 0), p["w2b"], p["b2b"], 1)
    x3 = conv(conv(x, p["w3a"], p["b3a"], 0), p["w3b"], p["b3b"], 2)
    mp = lax.reduce_window(x, -jnp.inf, lax.max, (1, 3, 3, 1), (1, 1, 1, 1),
                           [(0, 0), (1, 1), (1, 1), (0, 0)])
    x4 = conv(mp, p["w4"], p["b4"], 0)
    out = jnp.concatenate([x1, x2, x3, x4], axis=-1)
    return jnp.transpose(out, (0, 3, 1, 2))


# ---------------------------------- params -----------------------------------

def init_params(key, in_channels, c1, c2, c3, c4):
    def wb(k, K, cin, cout):
        k1, k2 = jax.random.split(k)
        w = 0.1 * jax.random.normal(k1, (K, K, cin, cout), jnp.float32)
        b = 0.1 * jax.random.normal(k2, (1, cout), jnp.float32)
        return w, b

    ks = jax.random.split(key, 6)
    p = {}
    p["w1"], p["b1"] = wb(ks[0], 1, in_channels, c1)
    p["w2a"], p["b2a"] = wb(ks[1], 1, in_channels, c2[0])
    p["w2b"], p["b2b"] = wb(ks[2], 3, c2[0], c2[1])
    p["w3a"], p["b3a"] = wb(ks[3], 1, in_channels, c3[0])
    p["w3b"], p["b3b"] = wb(ks[4], 5, c3[0], c3[1])
    p["w4"], p["b4"] = wb(ks[5], 1, in_channels, c4)
    return p


# ----------------------------------- main -------------------------------------

if __name__ == "__main__":
    key = jax.random.PRNGKey(0)
    kx, kp = jax.random.split(key)

    N, Cin, H, W = 2, 4, 16, 16
    c1, c2, c3, c4 = 8, (8, 16), (4, 8), 8

    x = jax.random.normal(kx, (N, Cin, H, W), jnp.float32)   # NCHW like PyTorch
    params = init_params(kp, Cin, c1, c2, c3, c4)

    out = jax.jit(inception_forward)(x, params)
    out = jax.block_until_ready(out)

    ref = inception_reference(x, params)
    assert out.shape == (N, c1 + c2[1] + c3[1] + c4, H, W), out.shape
    assert jnp.allclose(out, ref, rtol=5e-4, atol=5e-4), \
        float(jnp.max(jnp.abs(out - ref)))

    print("KERNEL_OK")
</pallas_src>

<mosaic_0001>
module attributes {stable_mosaic.version = 11 : i64} {
  func.func @_inception_kernel(%arg0: i32, %arg1: memref<1x4x256xf32, #tpu.memory_space<vmem>>, %arg2: memref<8x4xf32, #tpu.memory_space<vmem>>, %arg3: memref<8x1xf32, #tpu.memory_space<vmem>>, %arg4: memref<8x4xf32, #tpu.memory_space<vmem>>, %arg5: memref<8x1xf32, #tpu.memory_space<vmem>>, %arg6: memref<16x72xf32, #tpu.memory_space<vmem>>, %arg7: memref<16x1xf32, #tpu.memory_space<vmem>>, %arg8: memref<4x4xf32, #tpu.memory_space<vmem>>, %arg9: memref<4x1xf32, #tpu.memory_space<vmem>>, %arg10: memref<8x100xf32, #tpu.memory_space<vmem>>, %arg11: memref<8x1xf32, #tpu.memory_space<vmem>>, %arg12: memref<8x4xf32, #tpu.memory_space<vmem>>, %arg13: memref<8x1xf32, #tpu.memory_space<vmem>>, %arg14: memref<1x40x256xf32, #tpu.memory_space<vmem>>) attributes {dimension_semantics = [#tpu.dimension_semantics<parallel>], iteration_bounds = array<i64: 2>, scalar_prefetch = 0 : i64, scratch_operands = 0 : i64, tpu.core_type = #tpu.core_type<tc>, window_params = [{transform_indices = @transform_0, window_bounds = array<i64: 1, 4, 256>}, {pipeline_mode = #tpu.pipeline_mode<synchronous>, transform_indices = @transform_1, window_bounds = array<i64: 8, 4>}, {pipeline_mode = #tpu.pipeline_mode<synchronous>, transform_indices = @transform_2, window_bounds = array<i64: 8, 1>}, {pipeline_mode = #tpu.pipeline_mode<synchronous>, transform_indices = @transform_3, window_bounds = array<i64: 8, 4>}, {pipeline_mode = #tpu.pipeline_mode<synchronous>, transform_indices = @transform_4, window_bounds = array<i64: 8, 1>}, {pipeline_mode = #tpu.pipeline_mode<synchronous>, transform_indices = @transform_5, window_bounds = array<i64: 16, 72>}, {pipeline_mode = #tpu.pipeline_mode<synchronous>, transform_indices = @transform_6, window_bounds = array<i64: 16, 1>}, {pipeline_mode = #tpu.pipeline_mode<synchronous>, transform_indices = @transform_7, window_bounds = array<i64: 4, 4>}, {pipeline_mode = #tpu.pipeline_mode<synchronous>, transform_indices = @transform_8, window_bounds = array<i64: 4, 1>}, {pipeline_mode = #tpu.pipeline_mode<synchronous>, transform_indices = @transform_9, window_bounds = array<i64: 8, 100>}, {pipeline_mode = #tpu.pipeline_mode<synchronous>, transform_indices = @transform_10, window_bounds = array<i64: 8, 1>}, {pipeline_mode = #tpu.pipeline_mode<synchronous>, transform_indices = @transform_11, window_bounds = array<i64: 8, 4>}, {pipeline_mode = #tpu.pipeline_mode<synchronous>, transform_indices = @transform_12, window_bounds = array<i64: 8, 1>}, {transform_indices = @transform_13, window_bounds = array<i64: 1, 40, 256>}]} {
    %c0 = arith.constant 0 : index
    %c0_0 = arith.constant 0 : index
    %c0_1 = arith.constant 0 : index
    %0 = vector.load %arg1[%c0, %c0_0, %c0_1] : memref<1x4x256xf32, #tpu.memory_space<vmem>>, vector<1x4x256xf32>
    %1 = vector.shape_cast %0 : vector<1x4x256xf32> to vector<4x256xf32>
    %2 = tpu.iota {dimensions = array<i32: 1>} : vector<1x256xi32>
    %c15_i32 = arith.constant 15 : i32
    %3 = vector.broadcast %c15_i32 : i32 to vector<1x256xi32>
    %4 = arith.andi %2, %3 : vector<1x256xi32>
    %c0_2 = arith.constant 0 : index
    %c0_3 = arith.constant 0 : index
    %5 = vector.load %arg2[%c0_2, %c0_3] : memref<8x4xf32, #tpu.memory_space<vmem>>, vector<8x4xf32>
    %cst = arith.constant dense<0.000000e+00> : vector<8x256xf32>
    %6 = tpu.matmul %5, %1, %cst {dimension_numbers = #tpu.dot_dimension_numbers<[1], [0], [0], [1], [0, 0, 1, 1], [], []>} : vector<8x4xf32>, vector<4x256xf32>, vector<8x256xf32> -> vector<8x256xf32>
    %c0_4 = arith.constant 0 : index
    %c0_5 = arith.constant 0 : index
    %7 = vector.load %arg3[%c0_4, %c0_5] : memref<8x1xf32, #tpu.memory_space<vmem>>, vector<8x1xf32>
    %8 = vector.broadcast %7 : vector<8x1xf32> to vector<8x256xf32>
    %9 = arith.addf %6, %8 : vector<8x256xf32>
    %cst_6 = arith.constant 0.000000e+00 : f32
    %10 = vector.broadcast %cst_6 : f32 to vector<8x256xf32>
    %11 = arith.maximumf %9, %10 : vector<8x256xf32>
    %c0_7 = arith.constant 0 : index
    %c0_8 = arith.constant 0 : index
    %12 = vector.load %arg4[%c0_7, %c0_8] : memref<8x4xf32, #tpu.memory_space<vmem>>, vector<8x4xf32>
    %cst_9 = arith.constant dense<0.000000e+00> : vector<8x256xf32>
    %13 = tpu.matmul %12, %1, %cst_9 {dimension_numbers = #tpu.dot_dimension_numbers<[1], [0], [0], [1], [0, 0, 1, 1], [], []>} : vector<8x4xf32>, vector<4x256xf32>, vector<8x256xf32> -> vector<8x256xf32>
    %c0_10 = arith.constant 0 : index
    %c0_11 = arith.constant 0 : index
    %14 = vector.load %arg5[%c0_10, %c0_11] : memref<8x1xf32, #tpu.memory_space<vmem>>, vector<8x1xf32>
    %15 = vector.broadcast %14 : vector<8x1xf32> to vector<8x256xf32>
    %16 = arith.addf %13, %15 : vector<8x256xf32>
    %cst_12 = arith.constant 0.000000e+00 : f32
    %17 = vector.broadcast %cst_12 : f32 to vector<8x256xf32>
    %18 = arith.maximumf %16, %17 : vector<8x256xf32>
    %19 = vector.extract_strided_slice %18 {offsets = [0, 239], sizes = [8, 17], strides = [1, 1]} : vector<8x256xf32> to vector<8x17xf32>
    %20 = vector.extract_strided_slice %18 {offsets = [0, 0], sizes = [8, 239], strides = [1, 1]} : vector<8x256xf32> to vector<8x239xf32>
    %21 = tpu.concatenate %19, %20 in 1 : vector<8x17xf32>, vector<8x239xf32> -> vector<8x256xf32>
    %c16_i32 = arith.constant 16 : i32
    %22 = vector.broadcast %c16_i32 : i32 to vector<1x256xi32>
    %23 = arith.cmpi sge, %2, %22 : vector<1x256xi32>
    %c256_i32 = arith.constant 256 : i32
    %24 = vector.broadcast %c256_i32 : i32 to vector<1x256xi32>
    %25 = arith.cmpi slt, %2, %24 : vector<1x256xi32>
    %26 = arith.andi %23, %25 : vector<1x256xi1>
    %c1_i32 = arith.constant 1 : i32
    %27 = vector.broadcast %c1_i32 : i32 to vector<1x256xi32>
    %28 = arith.cmpi sge, %4, %27 : vector<1x256xi32>
    %c17_i32 = arith.constant 17 : i32
    %29 = vector.broadcast %c17_i32 : i32 to vector<1x256xi32>
    %30 = arith.cmpi slt, %4, %29 : vector<1x256xi32>
    %31 = arith.andi %28, %30 : vector<1x256xi1>
    %32 = arith.andi %26, %31 : vector<1x256xi1>
    %cst_13 = arith.constant 0.000000e+00 : f32
    %33 = vector.shape_cast %32 : vector<1x256xi1> to vector<1x256xi1>
    %34 = vector.broadcast %33 : vector<1x256xi1> to vector<8x256xi1>
    %35 = vector.broadcast %cst_13 : f32 to vector<8x256xf32>
    %36 = arith.select %34, %21, %35 : vector<8x256xi1>, vector<8x256xf32>
    %37 = vector.extract_strided_slice %18 {offsets = [0, 240], sizes = [8, 16], strides = [1, 1]} : vector<8x256xf32> to vector<8x16xf32>
    %38 = vector.extract_strided_slice %18 {offsets = [0, 0], sizes = [8, 240], strides = [1, 1]} : vector<8x256xf32> to vector<8x240xf32>
    %39 = tpu.concatenate %37, %38 in 1 : vector<8x16xf32>, vector<8x240xf32> -> vector<8x256xf32>
    %c16_i32_14 = arith.constant 16 : i32
    %40 = vector.broadcast %c16_i32_14 : i32 to vector<1x256xi32>
    %41 = arith.cmpi sge, %2, %40 : vector<1x256xi32>
    %c256_i32_15 = arith.constant 256 : i32
    %42 = vector.broadcast %c256_i32_15 : i32 to vector<1x256xi32>
    %43 = arith.cmpi slt, %2, %42 : vector<1x256xi32>
    %44 = arith.andi %41, %43 : vector<1x256xi1>
    %cst_16 = arith.constant 0.000000e+00 : f32
    %45 = vector.shape_cast %44 : vector<1x256xi1> to vector<1x256xi1>
    %46 = vector.broadcast %45 : vector<1x256xi1> to vector<8x256xi1>
    %47 = vector.broadcast %cst_16 : f32 to vector<8x256xf32>
    %48 = arith.select %46, %39, %47 : vector<8x256xi1>, vector<8x256xf32>
    %49 = vector.extract_strided_slice %18 {offsets = [0, 241], sizes = [8, 15], strides = [1, 1]} : vector<8x256xf32> to vector<8x15xf32>
    %50 = vector.extract_strided_slice %18 {offsets = [0, 0], sizes = [8, 241], strides = [1, 1]} : vector<8x256xf32> to vector<8x241xf32>
    %51 = tpu.concatenate %49, %50 in 1 : vector<8x15xf32>, vector<8x241xf32> -> vector<8x256xf32>
    %c16_i32_17 = arith.constant 16 : i32
    %52 = vector.broadcast %c16_i32_17 : i32 to vector<1x256xi32>
    %53 = arith.cmpi sge, %2, %52 : vector<1x256xi32>
    %c256_i32_18 = arith.constant 256 : i32
    %54 = vector.broadcast %c256_i32_18 : i32 to vector<1x256xi32>
    %55 = arith.cmpi slt, %2, %54 : vector<1x256xi32>
    %56 = arith.andi %53, %55 : vector<1x256xi1>
    %c-1_i32 = arith.constant -1 : i32
    %57 = vector.broadcast %c-1_i32 : i32 to vector<1x256xi32>
    %58 = arith.cmpi sge, %4, %57 : vector<1x256xi32>
    %c15_i32_19 = arith.constant 15 : i32
    %59 = vector.broadcast %c15_i32_19 : i32 to vector<1x256xi32>
    %60 = arith.cmpi slt, %4, %59 : vector<1x256xi32>
    %61 = arith.andi %58, %60 : vector<1x256xi1>
    %62 = arith.andi %56, %61 : vector<1x256xi1>
    %cst_20 = arith.constant 0.000000e+00 : f32
    %63 = vector.shape_cast %62 : vector<1x256xi1> to vector<1x256xi1>
    %64 = vector.broadcast %63 : vector<1x256xi1> to vector<8x256xi1>
    %65 = vector.broadcast %cst_20 : f32 to vector<8x256xf32>
    %66 = arith.select %64, %51, %65 : vector<8x256xi1>, vector<8x256xf32>
    %67 = vector.extract_strided_slice %18 {offsets = [0, 255], sizes = [8, 1], strides = [1, 1]} : vector<8x256xf32> to vector<8x1xf32>
    %68 = vector.extract_strided_slice %18 {offsets = [0, 0], sizes = [8, 255], strides = [1, 1]} : vector<8x256xf32> to vector<8x255xf32>
    %69 = tpu.concatenate %67, %68 in 1 : vector<8x1xf32>, vector<8x255xf32> -> vector<8x256xf32>
    %c1_i32_21 = arith.constant 1 : i32
    %70 = vector.broadcast %c1_i32_21 : i32 to vector<1x256xi32>
    %71 = arith.cmpi sge, %4, %70 : vector<1x256xi32>
    %c17_i32_22 = arith.constant 17 : i32
    %72 = vector.broadcast %c17_i32_22 : i32 to vector<1x256xi32>
    %73 = arith.cmpi slt, %4, %72 : vector<1x256xi32>
    %74 = arith.andi %71, %73 : vector<1x256xi1>
    %cst_23 = arith.constant 0.000000e+00 : f32
    %75 = vector.shape_cast %74 : vector<1x256xi1> to vector<1x256xi1>
    %76 = vector.broadcast %75 : vector<1x256xi1> to vector<8x256xi1>
    %77 = vector.broadcast %cst_23 : f32 to vector<8x256xf32>
    %78 = arith.select %76, %69, %77 : vector<8x256xi1>, vector<8x256xf32>
    %79 = vector.extract_strided_slice %18 {offsets = [0, 1], sizes = [8, 255], strides = [1, 1]} : vector<8x256xf32> to vector<8x255xf32>
    %80 = vector.extract_strided_slice %18 {offsets = [0, 0], sizes = [8, 1], strides = [1, 1]} : vector<8x256xf32> to vector<8x1xf32>
    %81 = tpu.concatenate %79, %80 in 1 : vector<8x255xf32>, vector<8x1xf32> -> vector<8x256xf32>
    %c-1_i32_24 = arith.constant -1 : i32
    %82 = vector.broadcast %c-1_i32_24 : i32 to vector<1x256xi32>
    %83 = arith.cmpi sge, %4, %82 : vector<1x256xi32>
    %c15_i32_25 = arith.constant 15 : i32
    %84 = vector.broadcast %c15_i32_25 : i32 to vector<1x256xi32>
    %85 = arith.cmpi slt, %4, %84 : vector<1x256xi32>
    %86 = arith.andi %83, %85 : vector<1x256xi1>
    %cst_26 = arith.constant 0.000000e+00 : f32
    %87 = vector.shape_cast %86 : vector<1x256xi1> to vector<1x256xi1>
    %88 = vector.broadcast %87 : vector<1x256xi1> to vector<8x256xi1>
    %89 = vector.broadcast %cst_26 : f32 to vector<8x256xf32>
    %90 = arith.select %88, %81, %89 : vector<8x256xi1>, vector<8x256xf32>
    %91 = vector.extract_strided_slice %18 {offsets = [0, 15], sizes = [8, 241], strides = [1, 1]} : vector<8x256xf32> to vector<8x241xf32>
    %92 = vector.extract_strided_slice %18 {offsets = [0, 0], sizes = [8, 15], strides = [1, 1]} : vector<8x256xf32> to vector<8x15xf32>
    %93 = tpu.concatenate %91, %92 in 1 : vector<8x241xf32>, vector<8x15xf32> -> vector<8x256xf32>
    %c0_i32 = arith.constant 0 : i32
    %94 = vector.broadcast %c0_i32 : i32 to vector<1x256xi32>
    %95 = arith.cmpi sge, %2, %94 : vector<1x256xi32>
    %c240_i32 = arith.constant 240 : i32
    %96 = vector.broadcast %c240_i32 : i32 to vector<1x256xi32>
    %97 = arith.cmpi slt, %2, %96 : vector<1x256xi32>
    %98 = arith.andi %95, %97 : vector<1x256xi1>
    %c1_i32_27 = arith.constant 1 : i32
    %99 = vector.broadcast %c1_i32_27 : i32 to vector<1x256xi32>
    %100 = arith.cmpi sge, %4, %99 : vector<1x256xi32>
    %c17_i32_28 = arith.constant 17 : i32
    %101 = vector.broadcast %c17_i32_28 : i32 to vector<1x256xi32>
    %102 = arith.cmpi slt, %4, %101 : vector<1x256xi32>
    %103 = arith.andi %100, %102 : vector<1x256xi1>
    %104 = arith.andi %98, %103 : vector<1x256xi1>
    %cst_29 = arith.constant 0.000000e+00 : f32
    %105 = vector.shape_cast %104 : vector<1x256xi1> to vector<1x256xi1>
    %106 = vector.broadcast %105 : vector<1x256xi1> to vector<8x256xi1>
    %107 = vector.broadcast %cst_29 : f32 to vector<8x256xf32>
    %108 = arith.select %106, %93, %107 : vector<8x256xi1>, vector<8x256xf32>
    %109 = vector.extract_strided_slice %18 {offsets = [0, 16], sizes = [8, 240], strides = [1, 1]} : vector<8x256xf32> to vector<8x240xf32>
    %110 = vector.extract_strided_slice %18 {offsets = [0, 0], sizes = [8, 16], strides = [1, 1]} : vector<8x256xf32> to vector<8x16xf32>
    %111 = tpu.concatenate %109, %110 in 1 : vector<8x240xf32>, vector<8x16xf32> -> vector<8x256xf32>
    %c0_i32_30 = arith.constant 0 : i32
    %112 = vector.broadcast %c0_i32_30 : i32 to vector<1x256xi32>
    %113 = arith.cmpi sge, %2, %112 : vector<1x256xi32>
    %c240_i32_31 = arith.constant 240 : i32
    %114 = vector.broadcast %c240_i32_31 : i32 to vector<1x256xi32>
    %115 = arith.cmpi slt, %2, %114 : vector<1x256xi32>
    %116 = arith.andi %113, %115 : vector<1x256xi1>
    %cst_32 = arith.constant 0.000000e+00 : f32
    %117 = vector.shape_cast %116 : vector<1x256xi1> to vector<1x256xi1>
    %118 = vector.broadcast %117 : vector<1x256xi1> to vector<8x256xi1>
    %119 = vector.broadcast %cst_32 : f32 to vector<8x256xf32>
    %120 = arith.select %118, %111, %119 : vector<8x256xi1>, vector<8x256xf32>
    %121 = vector.extract_strided_slice %18 {offsets = [0, 17], sizes = [8, 239], strides = [1, 1]} : vector<8x256xf32> to vector<8x239xf32>
    %122 = vector.extract_strided_slice %18 {offsets = [0, 0], sizes = [8, 17], strides = [1, 1]} : vector<8x256xf32> to vector<8x17xf32>
    %123 = tpu.concatenate %121, %122 in 1 : vector<8x239xf32>, vector<8x17xf32> -> vector<8x256xf32>
    %c0_i32_33 = arith.constant 0 : i32
    %124 = vector.broadcast %c0_i32_33 : i32 to vector<1x256xi32>
    %125 = arith.cmpi sge, %2, %124 : vector<1x256xi32>
    %c240_i32_34 = arith.constant 240 : i32
    %126 = vector.broadcast %c240_i32_34 : i32 to vector<1x256xi32>
    %127 = arith.cmpi slt, %2, %126 : vector<1x256xi32>
    %128 = arith.andi %125, %127 : vector<1x256xi1>
    %c-1_i32_35 = arith.constant -1 : i32
    %129 = vector.broadcast %c-1_i32_35 : i32 to vector<1x256xi32>
    %130 = arith.cmpi sge, %4, %129 : vector<1x256xi32>
    %c15_i32_36 = arith.constant 15 : i32
    %131 = vector.broadcast %c15_i32_36 : i32 to vector<1x256xi32>
    %132 = arith.cmpi slt, %4, %131 : vector<1x256xi32>
    %133 = arith.andi %130, %132 : vector<1x256xi1>
    %134 = arith.andi %128, %133 : vector<1x256xi1>
    %cst_37 = arith.constant 0.000000e+00 : f32
    %135 = vector.shape_cast %134 : vector<1x256xi1> to vector<1x256xi1>
    %136 = vector.broadcast %135 : vector<1x256xi1> to vector<8x256xi1>
    %137 = vector.broadcast %cst_37 : f32 to vector<8x256xf32>
    %138 = arith.select %136, %123, %137 : vector<8x256xi1>, vector<8x256xf32>
    %139 = tpu.concatenate %36, %48, %66, %78, %18, %90, %108, %120, %138 in 0 : vector<8x256xf32>, vector<8x256xf32>, vector<8x256xf32>, vector<8x256xf32>, vector<8x256xf32>, vector<8x256xf32>, vector<8x256xf32>, vector<8x256xf32>, vector<8x256xf32> -> vector<72x256xf32>
    %c0_38 = arith.constant 0 : index
    %c0_39 = arith.constant 0 : index
    %140 = vector.load %arg6[%c0_38, %c0_39] : memref<16x72xf32, #tpu.memory_space<vmem>>, vector<16x72xf32>
    %cst_40 = arith.constant dense<0.000000e+00> : vector<16x256xf32>
    %141 = tpu.matmul %140, %139, %cst_40 {dimension_numbers = #tpu.dot_dimension_numbers<[1], [0], [0], [1], [0, 0, 1, 1], [], []>} : vector<16x72xf32>, vector<72x256xf32>, vector<16x256xf32> -> vector<16x256xf32>
    %c0_41 = arith.constant 0 : index
    %c0_42 = arith.constant 0 : index
    %142 = vector.load %arg7[%c0_41, %c0_42] : memref<16x1xf32, #tpu.memory_space<vmem>>, vector<16x1xf32>
    %143 = vector.broadcast %142 : vector<16x1xf32> to vector<16x256xf32>
    %144 = arith.addf %141, %143 : vector<16x256xf32>
    %cst_43 = arith.constant 0.000000e+00 : f32
    %145 = vector.broadcast %cst_43 : f32 to vector<16x256xf32>
    %146 = arith.maximumf %144, %145 : vector<16x256xf32>
    %c0_44 = arith.constant 0 : index
    %c0_45 = arith.constant 0 : index
    %147 = vector.load %arg8[%c0_44, %c0_45] : memref<4x4xf32, #tpu.memory_space<vmem>>, vector<4x4xf32>
    %cst_46 = arith.constant dense<0.000000e+00> : vector<4x256xf32>
    %148 = tpu.matmul %147, %1, %cst_46 {dimension_numbers = #tpu.dot_dimension_numbers<[1], [0], [0], [1], [0, 0, 1, 1], [], []>} : vector<4x4xf32>, vector<4x256xf32>, vector<4x256xf32> -> vector<4x256xf32>
    %c0_47 = arith.constant 0 : index
    %c0_48 = arith.constant 0 : index
    %149 = vector.load %arg9[%c0_47, %c0_48] : memref<4x1xf32, #tpu.memory_space<vmem>>, vector<4x1xf32>
    %150 = vector.broadcast %149 : vector<4x1xf32> to vector<4x256xf32>
    %151 = arith.addf %148, %150 : vector<4x256xf32>
    %cst_49 = arith.constant 0.000000e+00 : f32
    %152 = vector.broadcast %cst_49 : f32 to vector<4x256xf32>
    %153 = arith.maximumf %151, %152 : vector<4x256xf32>
    %154 = vector.extract_strided_slice %153 {offsets = [0, 222], sizes = [4, 34], strides = [1, 1]} : vector<4x256xf32> to vector<4x34xf32>
    %155 = vector.extract_strided_slice %153 {offsets = [0, 0], sizes = [4, 222], strides = [1, 1]} : vector<4x256xf32> to vector<4x222xf32>
    %156 = tpu.concatenate %154, %155 in 1 : vector<4x34xf32>, vector<4x222xf32> -> vector<4x256xf32>
    %c32_i32 = arith.constant 32 : i32
    %157 = vector.broadcast %c32_i32 : i32 to vector<1x256xi32>
    %158 = arith.cmpi sge, %2, %157 : vector<1x256xi32>
    %c256_i32_50 = arith.constant 256 : i32
    %159 = vector.broadcast %c256_i32_50 : i32 to vector<1x256xi32>
    %160 = arith.cmpi slt, %2, %159 : vector<1x256xi32>
    %161 = arith.andi %158, %160 : vector<1x256xi1>
    %c2_i32 = arith.constant 2 : i32
    %162 = vector.broadcast %c2_i32 : i32 to vector<1x256xi32>
    %163 = arith.cmpi sge, %4, %162 : vector<1x256xi32>
    %c18_i32 = arith.constant 18 : i32
    %164 = vector.broadcast %c18_i32 : i32 to vector<1x256xi32>
    %165 = arith.cmpi slt, %4, %164 : vector<1x256xi32>
    %166 = arith.andi %163, %165 : vector<1x256xi1>
    %167 = arith.andi %161, %166 : vector<1x256xi1>
    %cst_51 = arith.constant 0.000000e+00 : f32
    %168 = vector.shape_cast %167 : vector<1x256xi1> to vector<1x256xi1>
    %169 = vector.broadcast %168 : vector<1x256xi1> to vector<4x256xi1>
    %170 = vector.broadcast %cst_51 : f32 to vector<4x256xf32>
    %171 = arith.select %169, %156, %170 : vector<4x256xi1>, vector<4x256xf32>
    %172 = vector.extract_strided_slice %153 {offsets = [0, 223], sizes = [4, 33], strides = [1, 1]} : vector<4x256xf32> to vector<4x33xf32>
    %173 = vector.extract_strided_slice %153 {offsets = [0, 0], sizes = [4, 223], strides = [1, 1]} : vector<4x256xf32> to vector<4x223xf32>
    %174 = tpu.concatenate %172, %173 in 1 : vector<4x33xf32>, vector<4x223xf32> -> vector<4x256xf32>
    %c32_i32_52 = arith.constant 32 : i32
    %175 = vector.broadcast %c32_i32_52 : i32 to vector<1x256xi32>
    %176 = arith.cmpi sge, %2, %175 : vector<1x256xi32>
    %c256_i32_53 = arith.constant 256 : i32
    %177 = vector.broadcast %c256_i32_53 : i32 to vector<1x256xi32>
    %178 = arith.cmpi slt, %2, %177 : vector<1x256xi32>
    %179 = arith.andi %176, %178 : vector<1x256xi1>
    %c1_i32_54 = arith.constant 1 : i32
    %180 = vector.broadcast %c1_i32_54 : i32 to vector<1x256xi32>
    %181 = arith.cmpi sge, %4, %180 : vector<1x256xi32>
    %c17_i32_55 = arith.constant 17 : i32
    %182 = vector.broadcast %c17_i32_55 : i32 to vector<1x256xi32>
    %183 = arith.cmpi slt, %4, %182 : vector<1x256xi32>
    %184 = arith.andi %181, %183 : vector<1x256xi1>
    %185 = arith.andi %179, %184 : vector<1x256xi1>
    %cst_56 = arith.constant 0.000000e+00 : f32
    %186 = vector.shape_cast %185 : vector<1x256xi1> to vector<1x256xi1>
    %187 = vector.broadcast %186 : vector<1x256xi1> to vector<4x256xi1>
    %188 = vector.broadcast %cst_56 : f32 to vector<4x256xf32>
    %189 = arith.select %187, %174, %188 : vector<4x256xi1>, vector<4x256xf32>
    %190 = vector.extract_strided_slice %153 {offsets = [0, 224], sizes = [4, 32], strides = [1, 1]} : vector<4x256xf32> to vector<4x32xf32>
    %191 = vector.extract_strided_slice %153 {offsets = [0, 0], sizes = [4, 224], strides = [1, 1]} : vector<4x256xf32> to vector<4x224xf32>
    %192 = tpu.concatenate %190, %191 in 1 : vector<4x32xf32>, vector<4x224xf32> -> vector<4x256xf32>
    %c32_i32_57 = arith.constant 32 : i32
    %193 = vector.broadcast %c32_i32_57 : i32 to vector<1x256xi32>
    %194 = arith.cmpi sge, %2, %193 : vector<1x256xi32>
    %c256_i32_58 = arith.constant 256 : i32
    %195 = vector.broadcast %c256_i32_58 : i32 to vector<1x256xi32>
    %196 = arith.cmpi slt, %2, %195 : vector<1x256xi32>
    %197 = arith.andi %194, %196 : vector<1x256xi1>
    %cst_59 = arith.constant 0.000000e+00 : f32
    %198 = vector.shape_cast %197 : vector<1x256xi1> to vector<1x256xi1>
    %199 = vector.broadcast %198 : vector<1x256xi1> to vector<4x256xi1>
    %200 = vector.broadcast %cst_59 : f32 to vector<4x256xf32>
    %201 = arith.select %199, %192, %200 : vector<4x256xi1>, vector<4x256xf32>
    %202 = vector.extract_strided_slice %153 {offsets = [0, 225], sizes = [4, 31], strides = [1, 1]} : vector<4x256xf32> to vector<4x31xf32>
    %203 = vector.extract_strided_slice %153 {offsets = [0, 0], sizes = [4, 225], strides = [1, 1]} : vector<4x256xf32> to vector<4x225xf32>
    %204 = tpu.concatenate %202, %203 in 1 : vector<4x31xf32>, vector<4x225xf32> -> vector<4x256xf32>
    %c32_i32_60 = arith.constant 32 : i32
    %205 = vector.broadcast %c32_i32_60 : i32 to vector<1x256xi32>
    %206 = arith.cmpi sge, %2, %205 : vector<1x256xi32>
    %c256_i32_61 = arith.constant 256 : i32
    %207 = vector.broadcast %c256_i32_61 : i32 to vector<1x256xi32>
    %208 = arith.cmpi slt, %2, %207 : vector<1x256xi32>
    %209 = arith.andi %206, %208 : vector<1x256xi1>
    %c-1_i32_62 = arith.constant -1 : i32
    %210 = vector.broadcast %c-1_i32_62 : i32 to vector<1x256xi32>
    %211 = arith.cmpi sge, %4, %210 : vector<1x256xi32>
    %c15_i32_63 = arith.constant 15 : i32
    %212 = vector.broadcast %c15_i32_63 : i32 to vector<1x256xi32>
    %213 = arith.cmpi slt, %4, %212 : vector<1x256xi32>
    %214 = arith.andi %211, %213 : vector<1x256xi1>
    %215 = arith.andi %209, %214 : vector<1x256xi1>
    %cst_64 = arith.constant 0.000000e+00 : f32
    %216 = vector.shape_cast %215 : vector<1x256xi1> to vector<1x256xi1>
    %217 = vector.broadcast %216 : vector<1x256xi1> to vector<4x256xi1>
    %218 = vector.broadcast %cst_64 : f32 to vector<4x256xf32>
    %219 = arith.select %217, %204, %218 : vector<4x256xi1>, vector<4x256xf32>
    %220 = vector.extract_strided_slice %153 {offsets = [0, 226], sizes = [4, 30], strides = [1, 1]} : vector<4x256xf32> to vector<4x30xf32>
    %221 = vector.extract_strided_slice %153 {offsets = [0, 0], sizes = [4, 226], strides = [1, 1]} : vector<4x256xf32> to vector<4x226xf32>
    %222 = tpu.concatenate %220, %221 in 1 : vector<4x30xf32>, vector<4x226xf32> -> vector<4x256xf32>
    %c32_i32_65 = arith.constant 32 : i32
    %223 = vector.broadcast %c32_i32_65 : i32 to vector<1x256xi32>
    %224 = arith.cmpi sge, %2, %223 : vector<1x256xi32>
    %c256_i32_66 = arith.constant 256 : i32
    %225 = vector.broadcast %c256_i32_66 : i32 to vector<1x256xi32>
    %226 = arith.cmpi slt, %2, %225 : vector<1x256xi32>
    %227 = arith.andi %224, %226 : vector<1x256xi1>
    %c-2_i32 = arith.constant -2 : i32
    %228 = vector.broadcast %c-2_i32 : i32 to vector<1x256xi32>
    %229 = arith.cmpi sge, %4, %228 : vector<1x256xi32>
    %c14_i32 = arith.constant 14 : i32
    %230 = vector.broadcast %c14_i32 : i32 to vector<1x256xi32>
    %231 = arith.cmpi slt, %4, %230 : vector<1x256xi32>
    %232 = arith.andi %229, %231 : vector<1x256xi1>
    %233 = arith.andi %227, %232 : vector<1x256xi1>
    %cst_67 = arith.constant 0.000000e+00 : f32
    %234 = vector.shape_cast %233 : vector<1x256xi1> to vector<1x256xi1>
    %235 = vector.broadcast %234 : vector<1x256xi1> to vector<4x256xi1>
    %236 = vector.broadcast %cst_67 : f32 to vector<4x256xf32>
    %237 = arith.select %235, %222, %236 : vector<4x256xi1>, vector<4x256xf32>
    %238 = vector.extract_strided_slice %153 {offsets = [0, 238], sizes = [4, 18], strides = [1, 1]} : vector<4x256xf32> to vector<4x18xf32>
    %239 = vector.extract_strided_slice %153 {offsets = [0, 0], sizes = [4, 238], strides = [1, 1]} : vector<4x256xf32> to vector<4x238xf32>
    %240 = tpu.concatenate %238, %239 in 1 : vector<4x18xf32>, vector<4x238xf32> -> vector<4x256xf32>
    %c16_i32_68 = arith.constant 16 : i32
    %241 = vector.broadcast %c16_i32_68 : i32 to vector<1x256xi32>
    %242 = arith.cmpi sge, %2, %241 : vector<1x256xi32>
    %c256_i32_69 = arith.constant 256 : i32
    %243 = vector.broadcast %c256_i32_69 : i32 to vector<1x256xi32>
    %244 = arith.cmpi slt, %2, %243 : vector<1x256xi32>
    %245 = arith.andi %242, %244 : vector<1x256xi1>
    %c2_i32_70 = arith.constant 2 : i32
    %246 = vector.broadcast %c2_i32_70 : i32 to vector<1x256xi32>
    %247 = arith.cmpi sge, %4, %246 : vector<1x256xi32>
    %c18_i32_71 = arith.constant 18 : i32
    %248 = vector.broadcast %c18_i32_71 : i32 to vector<1x256xi32>
    %249 = arith.cmpi slt, %4, %248 : vector<1x256xi32>
    %250 = arith.andi %247, %249 : vector<1x256xi1>
    %251 = arith.andi %245, %250 : vector<1x256xi1>
    %cst_72 = arith.constant 0.000000e+00 : f32
    %252 = vector.shape_cast %251 : vector<1x256xi1> to vector<1x256xi1>
    %253 = vector.broadcast %252 : vector<1x256xi1> to vector<4x256xi1>
    %254 = vector.broadcast %cst_72 : f32 to vector<4x256xf32>
    %255 = arith.select %253, %240, %254 : vector<4x256xi1>, vector<4x256xf32>
    %256 = vector.extract_strided_slice %153 {offsets = [0, 239], sizes = [4, 17], strides = [1, 1]} : vector<4x256xf32> to vector<4x17xf32>
    %257 = vector.extract_strided_slice %153 {offsets = [0, 0], sizes = [4, 239], strides = [1, 1]} : vector<4x256xf32> to vector<4x239xf32>
    %258 = tpu.concatenate %256, %257 in 1 : vector<4x17xf32>, vector<4x239xf32> -> vector<4x256xf32>
    %c16_i32_73 = arith.constant 16 : i32
    %259 = vector.broadcast %c16_i32_73 : i32 to vector<1x256xi32>
    %260 = arith.cmpi sge, %2, %259 : vector<1x256xi32>
    %c256_i32_74 = arith.constant 256 : i32
    %261 = vector.broadcast %c256_i32_74 : i32 to vector<1x256xi32>
    %262 = arith.cmpi slt, %2, %261 : vector<1x256xi32>
    %263 = arith.andi %260, %262 : vector<1x256xi1>
    %c1_i32_75 = arith.constant 1 : i32
    %264 = vector.broadcast %c1_i32_75 : i32 to vector<1x256xi32>
    %265 = arith.cmpi sge, %4, %264 : vector<1x256xi32>
    %c17_i32_76 = arith.constant 17 : i32
    %266 = vector.broadcast %c17_i32_76 : i32 to vector<1x256xi32>
    %267 = arith.cmpi slt, %4, %266 : vector<1x256xi32>
    %268 = arith.andi %265, %267 : vector<1x256xi1>
    %269 = arith.andi %263, %268 : vector<1x256xi1>
    %cst_77 = arith.constant 0.000000e+00 : f32
    %270 = vector.shape_cast %269 : vector<1x256xi1> to vector<1x256xi1>
    %271 = vector.broadcast %270 : vector<1x256xi1> to vector<4x256xi1>
    %272 = vector.broadcast %cst_77 : f32 to vector<4x256xf32>
    %273 = arith.select %271, %258, %272 : vector<4x256xi1>, vector<4x256xf32>
    %274 = vector.extract_strided_slice %153 {offsets = [0, 240], sizes = [4, 16], strides = [1, 1]} : vector<4x256xf32> to vector<4x16xf32>
    %275 = vector.extract_strided_slice %153 {offsets = [0, 0], sizes = [4, 240], strides = [1, 1]} : vector<4x256xf32> to vector<4x240xf32>
    %276 = tpu.concatenate %274, %275 in 1 : vector<4x16xf32>, vector<4x240xf32> -> vector<4x256xf32>
    %c16_i32_78 = arith.constant 16 : i32
    %277 = vector.broadcast %c16_i32_78 : i32 to vector<1x256xi32>
    %278 = arith.cmpi sge, %2, %277 : vector<1x256xi32>
    %c256_i32_79 = arith.constant 256 : i32
    %279 = vector.broadcast %c256_i32_79 : i32 to vector<1x256xi32>
    %280 = arith.cmpi slt, %2, %279 : vector<1x256xi32>
    %281 = arith.andi %278, %280 : vector<1x256xi1>
    %cst_80 = arith.constant 0.000000e+00 : f32
    %282 = vector.shape_cast %281 : vector<1x256xi1> to vector<1x256xi1>
    %283 = vector.broadcast %282 : vector<1x256xi1> to vector<4x256xi1>
    %284 = vector.broadcast %cst_80 : f32 to vector<4x256xf32>
    %285 = arith.select %283, %276, %284 : vector<4x256xi1>, vector<4x256xf32>
    %286 = vector.extract_strided_slice %153 {offsets = [0, 241], sizes = [4, 15], strides = [1, 1]} : vector<4x256xf32> to vector<4x15xf32>
    %287 = vector.extract_strided_slice %153 {offsets = [0, 0], sizes = [4, 241], strides = [1, 1]} : vector<4x256xf32> to vector<4x241xf32>
    %288 = tpu.concatenate %286, %287 in 1 : vector<4x15xf32>, vector<4x241xf32> -> vector<4x256xf32>
    %c16_i32_81 = arith.constant 16 : i32
    %289 = vector.broadcast %c16_i32_81 : i32 to vector<1x256xi32>
    %290 = arith.cmpi sge, %2, %289 : vector<1x256xi32>
    %c256_i32_82 = arith.constant 256 : i32
    %291 = vector.broadcast %c256_i32_82 : i32 to vector<1x256xi32>
    %292 = arith.cmpi slt, %2, %291 : vector<1x256xi32>
    %293 = arith.andi %290, %292 : vector<1x256xi1>
    %c-1_i32_83 = arith.constant -1 : i32
    %294 = vector.broadcast %c-1_i32_83 : i32 to vector<1x256xi32>
    %295 = arith.cmpi sge, %4, %294 : vector<1x256xi32>
    %c15_i32_84 = arith.constant 15 : i32
    %296 = vector.broadcast %c15_i32_84 : i32 to vector<1x256xi32>
    %297 = arith.cmpi slt, %4, %296 : vector<1x256xi32>
    %298 = arith.andi %295, %297 : vector<1x256xi1>
    %299 = arith.andi %293, %298 : vector<1x256xi1>
    %cst_85 = arith.constant 0.000000e+00 : f32
    %300 = vector.shape_cast %299 : vector<1x256xi1> to vector<1x256xi1>
    %301 = vector.broadcast %300 : vector<1x256xi1> to vector<4x256xi1>
    %302 = vector.broadcast %cst_85 : f32 to vector<4x256xf32>
    %303 = arith.select %301, %288, %302 : vector<4x256xi1>, vector<4x256xf32>
    %304 = vector.extract_strided_slice %153 {offsets = [0, 242], sizes = [4, 14], strides = [1, 1]} : vector<4x256xf32> to vector<4x14xf32>
    %305 = vector.extract_strided_slice %153 {offsets = [0, 0], sizes = [4, 242], strides = [1, 1]} : vector<4x256xf32> to vector<4x242xf32>
    %306 = tpu.concatenate %304, %305 in 1 : vector<4x14xf32>, vector<4x242xf32> -> vector<4x256xf32>
    %c16_i32_86 = arith.constant 16 : i32
    %307 = vector.broadcast %c16_i32_86 : i32 to vector<1x256xi32>
    %308 = arith.cmpi sge, %2, %307 : vector<1x256xi32>
    %c256_i32_87 = arith.constant 256 : i32
    %309 = vector.broadcast %c256_i32_87 : i32 to vector<1x256xi32>
    %310 = arith.cmpi slt, %2, %309 : vector<1x256xi32>
    %311 = arith.andi %308, %310 : vector<1x256xi1>
    %c-2_i32_88 = arith.constant -2 : i32
    %312 = vector.broadcast %c-2_i32_88 : i32 to vector<1x256xi32>
    %313 = arith.cmpi sge, %4, %312 : vector<1x256xi32>
    %c14_i32_89 = arith.constant 14 : i32
    %314 = vector.broadcast %c14_i32_89 : i32 to vector<1x256xi32>
    %315 = arith.cmpi slt, %4, %314 : vector<1x256xi32>
    %316 = arith.andi %313, %315 : vector<1x256xi1>
    %317 = arith.andi %311, %316 : vector<1x256xi1>
    %cst_90 = arith.constant 0.000000e+00 : f32
    %318 = vector.shape_cast %317 : vector<1x256xi1> to vector<1x256xi1>
    %319 = vector.broadcast %318 : vector<1x256xi1> to vector<4x256xi1>
    %320 = vector.broadcast %cst_90 : f32 to vector<4x256xf32>
    %321 = arith.select %319, %306, %320 : vector<4x256xi1>, vector<4x256xf32>
    %322 = vector.extract_strided_slice %153 {offsets = [0, 254], sizes = [4, 2], strides = [1, 1]} : vector<4x256xf32> to vector<4x2xf32>
    %323 = vector.extract_strided_slice %153 {offsets = [0, 0], sizes = [4, 254], strides = [1, 1]} : vector<4x256xf32> to vector<4x254xf32>
    %324 = tpu.concatenate %322, %323 in 1 : vector<4x2xf32>, vector<4x254xf32> -> vector<4x256xf32>
    %c2_i32_91 = arith.constant 2 : i32
    %325 = vector.broadcast %c2_i32_91 : i32 to vector<1x256xi32>
    %326 = arith.cmpi sge, %4, %325 : vector<1x256xi32>
    %c18_i32_92 = arith.constant 18 : i32
    %327 = vector.broadcast %c18_i32_92 : i32 to vector<1x256xi32>
    %328 = arith.cmpi slt, %4, %327 : vector<1x256xi32>
    %329 = arith.andi %326, %328 : vector<1x256xi1>
    %cst_93 = arith.constant 0.000000e+00 : f32
    %330 = vector.shape_cast %329 : vector<1x256xi1> to vector<1x256xi1>
    %331 = vector.broadcast %330 : vector<1x256xi1> to vector<4x256xi1>
    %332 = vector.broadcast %cst_93 : f32 to vector<4x256xf32>
    %333 = arith.select %331, %324, %332 : vector<4x256xi1>, vector<4x256xf32>
    %334 = vector.extract_strided_slice %153 {offsets = [0, 255], sizes = [4, 1], strides = [1, 1]} : vector<4x256xf32> to vector<4x1xf32>
    %335 = vector.extract_strided_slice %153 {offsets = [0, 0], sizes = [4, 255], strides = [1, 1]} : vector<4x256xf32> to vector<4x255xf32>
    %336 = tpu.concatenate %334, %335 in 1 : vector<4x1xf32>, vector<4x255xf32> -> vector<4x256xf32>
    %c1_i32_94 = arith.constant 1 : i32
    %337 = vector.broadcast %c1_i32_94 : i32 to vector<1x256xi32>
    %338 = arith.cmpi sge, %4, %337 : vector<1x256xi32>
    %c17_i32_95 = arith.constant 17 : i32
    %339 = vector.broadcast %c17_i32_95 : i32 to vector<1x256xi32>
    %340 = arith.cmpi slt, %4, %339 : vector<1x256xi32>
    %341 = arith.andi %338, %340 : vector<1x256xi1>
    %cst_96 = arith.constant 0.000000e+00 : f32
    %342 = vector.shape_cast %341 : vector<1x256xi1> to vector<1x256xi1>
    %343 = vector.broadcast %342 : vector<1x256xi1> to vector<4x256xi1>
    %344 = vector.broadcast %cst_96 : f32 to vector<4x256xf32>
    %345 = arith.select %343, %336, %344 : vector<4x256xi1>, vector<4x256xf32>
    %346 = vector.extract_strided_slice %153 {offsets = [0, 1], sizes = [4, 255], strides = [1, 1]} : vector<4x256xf32> to vector<4x255xf32>
    %347 = vector.extract_strided_slice %153 {offsets = [0, 0], sizes = [4, 1], strides = [1, 1]} : vector<4x256xf32> to vector<4x1xf32>
    %348 = tpu.concatenate %346, %347 in 1 : vector<4x255xf32>, vector<4x1xf32> -> vector<4x256xf32>
    %c-1_i32_97 = arith.constant -1 : i32
    %349 = vector.broadcast %c-1_i32_97 : i32 to vector<1x256xi32>
    %350 = arith.cmpi sge, %4, %349 : vector<1x256xi32>
    %c15_i32_98 = arith.constant 15 : i32
    %351 = vector.broadcast %c15_i32_98 : i32 to vector<1x256xi32>
    %352 = arith.cmpi slt, %4, %351 : vector<1x256xi32>
    %353 = arith.andi %350, %352 : vector<1x256xi1>
    %cst_99 = arith.constant 0.000000e+00 : f32
    %354 = vector.shape_cast %353 : vector<1x256xi1> to vector<1x256xi1>
    %355 = vector.broadcast %354 : vector<1x256xi1> to vector<4x256xi1>
    %356 = vector.broadcast %cst_99 : f32 to vector<4x256xf32>
    %357 = arith.select %355, %348, %356 : vector<4x256xi1>, vector<4x256xf32>
    %358 = vector.extract_strided_slice %153 {offsets = [0, 2], sizes = [4, 254], strides = [1, 1]} : vector<4x256xf32> to vector<4x254xf32>
    %359 = vector.extract_strided_slice %153 {offsets = [0, 0], sizes = [4, 2], strides = [1, 1]} : vector<4x256xf32> to vector<4x2xf32>
    %360 = tpu.concatenate %358, %359 in 1 : vector<4x254xf32>, vector<4x2xf32> -> vector<4x256xf32>
    %c-2_i32_100 = arith.constant -2 : i32
    %361 = vector.broadcast %c-2_i32_100 : i32 to vector<1x256xi32>
    %362 = arith.cmpi sge, %4, %361 : vector<1x256xi32>
    %c14_i32_101 = arith.constant 14 : i32
    %363 = vector.broadcast %c14_i32_101 : i32 to vector<1x256xi32>
    %364 = arith.cmpi slt, %4, %363 : vector<1x256xi32>
    %365 = arith.andi %362, %364 : vector<1x256xi1>
    %cst_102 = arith.constant 0.000000e+00 : f32
    %366 = vector.shape_cast %365 : vector<1x256xi1> to vector<1x256xi1>
    %367 = vector.broadcast %366 : vector<1x256xi1> to vector<4x256xi1>
    %368 = vector.broadcast %cst_102 : f32 to vector<4x256xf32>
    %369 = arith.select %367, %360, %368 : vector<4x256xi1>, vector<4x256xf32>
    %370 = vector.extract_strided_slice %153 {offsets = [0, 14], sizes = [4, 242], strides = [1, 1]} : vector<4x256xf32> to vector<4x242xf32>
    %371 = vector.extract_strided_slice %153 {offsets = [0, 0], sizes = [4, 14], strides = [1, 1]} : vector<4x256xf32> to vector<4x14xf32>
    %372 = tpu.concatenate %370, %371 in 1 : vector<4x242xf32>, vector<4x14xf32> -> vector<4x256xf32>
    %c0_i32_103 = arith.constant 0 : i32
    %373 = vector.broadcast %c0_i32_103 : i32 to vector<1x256xi32>
    %374 = arith.cmpi sge, %2, %373 : vector<1x256xi32>
    %c240_i32_104 = arith.constant 240 : i32
    %375 = vector.broadcast %c240_i32_104 : i32 to vector<1x256xi32>
    %376 = arith.cmpi slt, %2, %375 : vector<1x256xi32>
    %377 = arith.andi %374, %376 : vector<1x256xi1>
    %c2_i32_105 = arith.constant 2 : i32
    %378 = vector.broadcast %c2_i32_105 : i32 to vector<1x256xi32>
    %379 = arith.cmpi sge, %4, %378 : vector<1x256xi32>
    %c18_i32_106 = arith.constant 18 : i32
    %380 = vector.broadcast %c18_i32_106 : i32 to vector<1x256xi32>
    %381 = arith.cmpi slt, %4, %380 : vector<1x256xi32>
    %382 = arith.andi %379, %381 : vector<1x256xi1>
    %383 = arith.andi %377, %382 : vector<1x256xi1>
    %cst_107 = arith.constant 0.000000e+00 : f32
    %384 = vector.shape_cast %383 : vector<1x256xi1> to vector<1x256xi1>
    %385 = vector.broadcast %384 : vector<1x256xi1> to vector<4x256xi1>
    %386 = vector.broadcast %cst_107 : f32 to vector<4x256xf32>
    %387 = arith.select %385, %372, %386 : vector<4x256xi1>, vector<4x256xf32>
    %388 = vector.extract_strided_slice %153 {offsets = [0, 15], sizes = [4, 241], strides = [1, 1]} : vector<4x256xf32> to vector<4x241xf32>
    %389 = vector.extract_strided_slice %153 {offsets = [0, 0], sizes = [4, 15], strides = [1, 1]} : vector<4x256xf32> to vector<4x15xf32>
    %390 = tpu.concatenate %388, %389 in 1 : vector<4x241xf32>, vector<4x15xf32> -> vector<4x256xf32>
    %c0_i32_108 = arith.constant 0 : i32
    %391 = vector.broadcast %c0_i32_108 : i32 to vector<1x256xi32>
    %392 = arith.cmpi sge, %2, %391 : vector<1x256xi32>
    %c240_i32_109 = arith.constant 240 : i32
    %393 = vector.broadcast %c240_i32_109 : i32 to vector<1x256xi32>
    %394 = arith.cmpi slt, %2, %393 : vector<1x256xi32>
    %395 = arith.andi %392, %394 : vector<1x256xi1>
    %c1_i32_110 = arith.constant 1 : i32
    %396 = vector.broadcast %c1_i32_110 : i32 to vector<1x256xi32>
    %397 = arith.cmpi sge, %4, %396 : vector<1x256xi32>
    %c17_i32_111 = arith.constant 17 : i32
    %398 = vector.broadcast %c17_i32_111 : i32 to vector<1x256xi32>
    %399 = arith.cmpi slt, %4, %398 : vector<1x256xi32>
    %400 = arith.andi %397, %399 : vector<1x256xi1>
    %401 = arith.andi %395, %400 : vector<1x256xi1>
    %cst_112 = arith.constant 0.000000e+00 : f32
    %402 = vector.shape_cast %401 : vector<1x256xi1> to vector<1x256xi1>
    %403 = vector.broadcast %402 : vector<1x256xi1> to vector<4x256xi1>
    %404 = vector.broadcast %cst_112 : f32 to vector<4x256xf32>
    %405 = arith.select %403, %390, %404 : vector<4x256xi1>, vector<4x256xf32>
    %406 = vector.extract_strided_slice %153 {offsets = [0, 16], sizes = [4, 240], strides = [1, 1]} : vector<4x256xf32> to vector<4x240xf32>
    %407 = vector.extract_strided_slice %153 {offsets = [0, 0], sizes = [4, 16], strides = [1, 1]} : vector<4x256xf32> to vector<4x16xf32>
    %408 = tpu.concatenate %406, %407 in 1 : vector<4x240xf32>, vector<4x16xf32> -> vector<4x256xf32>
    %c0_i32_113 = arith.constant 0 : i32
    %409 = vector.broadcast %c0_i32_113 : i32 to vector<1x256xi32>
    %410 = arith.cmpi sge, %2, %409 : vector<1x256xi32>
    %c240_i32_114 = arith.constant 240 : i32
    %411 = vector.broadcast %c240_i32_114 : i32 to vector<1x256xi32>
    %412 = arith.cmpi slt, %2, %411 : vector<1x256xi32>
    %413 = arith.andi %410, %412 : vector<1x256xi1>
    %cst_115 = arith.constant 0.000000e+00 : f32
    %414 = vector.shape_cast %413 : vector<1x256xi1> to vector<1x256xi1>
    %415 = vector.broadcast %414 : vector<1x256xi1> to vector<4x256xi1>
    %416 = vector.broadcast %cst_115 : f32 to vector<4x256xf32>
    %417 = arith.select %415, %408, %416 : vector<4x256xi1>, vector<4x256xf32>
    %418 = vector.extract_strided_slice %153 {offsets = [0, 17], sizes = [4, 239], strides = [1, 1]} : vector<4x256xf32> to vector<4x239xf32>
    %419 = vector.extract_strided_slice %153 {offsets = [0, 0], sizes = [4, 17], strides = [1, 1]} : vector<4x256xf32> to vector<4x17xf32>
    %420 = tpu.concatenate %418, %419 in 1 : vector<4x239xf32>, vector<4x17xf32> -> vector<4x256xf32>
    %c0_i32_116 = arith.constant 0 : i32
    %421 = vector.broadcast %c0_i32_116 : i32 to vector<1x256xi32>
    %422 = arith.cmpi sge, %2, %421 : vector<1x256xi32>
    %c240_i32_117 = arith.constant 240 : i32
    %423 = vector.broadcast %c240_i32_117 : i32 to vector<1x256xi32>
    %424 = arith.cmpi slt, %2, %423 : vector<1x256xi32>
    %425 = arith.andi %422, %424 : vector<1x256xi1>
    %c-1_i32_118 = arith.constant -1 : i32
    %426 = vector.broadcast %c-1_i32_118 : i32 to vector<1x256xi32>
    %427 = arith.cmpi sge, %4, %426 : vector<1x256xi32>
    %c15_i32_119 = arith.constant 15 : i32
    %428 = vector.broadcast %c15_i32_119 : i32 to vector<1x256xi32>
    %429 = arith.cmpi slt, %4, %428 : vector<1x256xi32>
    %430 = arith.andi %427, %429 : vector<1x256xi1>
    %431 = arith.andi %425, %430 : vector<1x256xi1>
    %cst_120 = arith.constant 0.000000e+00 : f32
    %432 = vector.shape_cast %431 : vector<1x256xi1> to vector<1x256xi1>
    %433 = vector.broadcast %432 : vector<1x256xi1> to vector<4x256xi1>
    %434 = vector.broadcast %cst_120 : f32 to vector<4x256xf32>
    %435 = arith.select %433, %420, %434 : vector<4x256xi1>, vector<4x256xf32>
    %436 = vector.extract_strided_slice %153 {offsets = [0, 18], sizes = [4, 238], strides = [1, 1]} : vector<4x256xf32> to vector<4x238xf32>
    %437 = vector.extract_strided_slice %153 {offsets = [0, 0], sizes = [4, 18], strides = [1, 1]} : vector<4x256xf32> to vector<4x18xf32>
    %438 = tpu.concatenate %436, %437 in 1 : vector<4x238xf32>, vector<4x18xf32> -> vector<4x256xf32>
    %c0_i32_121 = arith.constant 0 : i32
    %439 = vector.broadcast %c0_i32_121 : i32 to vector<1x256xi32>
    %440 = arith.cmpi sge, %2, %439 : vector<1x256xi32>
    %c240_i32_122 = arith.constant 240 : i32
    %441 = vector.broadcast %c240_i32_122 : i32 to vector<1x256xi32>
    %442 = arith.cmpi slt, %2, %441 : vector<1x256xi32>
    %443 = arith.andi %440, %442 : vector<1x256xi1>
    %c-2_i32_123 = arith.constant -2 : i32
    %444 = vector.broadcast %c-2_i32_123 : i32 to vector<1x256xi32>
    %445 = arith.cmpi sge, %4, %444 : vector<1x256xi32>
    %c14_i32_124 = arith.constant 14 : i32
    %446 = vector.broadcast %c14_i32_124 : i32 to vector<1x256xi32>
    %447 = arith.cmpi slt, %4, %446 : vector<1x256xi32>
    %448 = arith.andi %445, %447 : vector<1x256xi1>
    %449 = arith.andi %443, %448 : vector<1x256xi1>
    %cst_125 = arith.constant 0.000000e+00 : f32
    %450 = vector.shape_cast %449 : vector<1x256xi1> to vector<1x256xi1>
    %451 = vector.broadcast %450 : vector<1x256xi1> to vector<4x256xi1>
    %452 = vector.broadcast %cst_125 : f32 to vector<4x256xf32>
    %453 = arith.select %451, %438, %452 : vector<4x256xi1>, vector<4x256xf32>
    %454 = vector.extract_strided_slice %153 {offsets = [0, 30], sizes = [4, 226], strides = [1, 1]} : vector<4x256xf32> to vector<4x226xf32>
    %455 = vector.extract_strided_slice %153 {offsets = [0, 0], sizes = [4, 30], strides = [1, 1]} : vector<4x256xf32> to vector<4x30xf32>
    %456 = tpu.concatenate %454, %455 in 1 : vector<4x226xf32>, vector<4x30xf32> -> vector<4x256xf32>
    %c0_i32_126 = arith.constant 0 : i32
    %457 = vector.broadcast %c0_i32_126 : i32 to vector<1x256xi32>
    %458 = arith.cmpi sge, %2, %457 : vector<1x256xi32>
    %c224_i32 = arith.constant 224 : i32
    %459 = vector.broadcast %c224_i32 : i32 to vector<1x256xi32>
    %460 = arith.cmpi slt, %2, %459 : vector<1x256xi32>
    %461 = arith.andi %458, %460 : vector<1x256xi1>
    %c2_i32_127 = arith.constant 2 : i32
    %462 = vector.broadcast %c2_i32_127 : i32 to vector<1x256xi32>
    %463 = arith.cmpi sge, %4, %462 : vector<1x256xi32>
    %c18_i32_128 = arith.constant 18 : i32
    %464 = vector.broadcast %c18_i32_128 : i32 to vector<1x256xi32>
    %465 = arith.cmpi slt, %4, %464 : vector<1x256xi32>
    %466 = arith.andi %463, %465 : vector<1x256xi1>
    %467 = arith.andi %461, %466 : vector<1x256xi1>
    %cst_129 = arith.constant 0.000000e+00 : f32
    %468 = vector.shape_cast %467 : vector<1x256xi1> to vector<1x256xi1>
    %469 = vector.broadcast %468 : vector<1x256xi1> to vector<4x256xi1>
    %470 = vector.broadcast %cst_129 : f32 to vector<4x256xf32>
    %471 = arith.select %469, %456, %470 : vector<4x256xi1>, vector<4x256xf32>
    %472 = vector.extract_strided_slice %153 {offsets = [0, 31], sizes = [4, 225], strides = [1, 1]} : vector<4x256xf32> to vector<4x225xf32>
    %473 = vector.extract_strided_slice %153 {offsets = [0, 0], sizes = [4, 31], strides = [1, 1]} : vector<4x256xf32> to vector<4x31xf32>
    %474 = tpu.concatenate %472, %473 in 1 : vector<4x225xf32>, vector<4x31xf32> -> vector<4x256xf32>
    %c0_i32_130 = arith.constant 0 : i32
    %475 = vector.broadcast %c0_i32_130 : i32 to vector<1x256xi32>
    %476 = arith.cmpi sge, %2, %475 : vector<1x256xi32>
    %c224_i32_131 = arith.constant 224 : i32
    %477 = vector.broadcast %c224_i32_131 : i32 to vector<1x256xi32>
    %478 = arith.cmpi slt, %2, %477 : vector<1x256xi32>
    %479 = arith.andi %476, %478 : vector<1x256xi1>
    %c1_i32_132 = arith.constant 1 : i32
    %480 = vector.broadcast %c1_i32_132 : i32 to vector<1x256xi32>
    %481 = arith.cmpi sge, %4, %480 : vector<1x256xi32>
    %c17_i32_133 = arith.constant 17 : i32
    %482 = vector.broadcast %c17_i32_133 : i32 to vector<1x256xi32>
    %483 = arith.cmpi slt, %4, %482 : vector<1x256xi32>
    %484 = arith.andi %481, %483 : vector<1x256xi1>
    %485 = arith.andi %479, %484 : vector<1x256xi1>
    %cst_134 = arith.constant 0.000000e+00 : f32
    %486 = vector.shape_cast %485 : vector<1x256xi1> to vector<1x256xi1>
    %487 = vector.broadcast %486 : vector<1x256xi1> to vector<4x256xi1>
    %488 = vector.broadcast %cst_134 : f32 to vector<4x256xf32>
    %489 = arith.select %487, %474, %488 : vector<4x256xi1>, vector<4x256xf32>
    %490 = vector.extract_strided_slice %153 {offsets = [0, 32], sizes = [4, 224], strides = [1, 1]} : vector<4x256xf32> to vector<4x224xf32>
    %491 = vector.extract_strided_slice %153 {offsets = [0, 0], sizes = [4, 32], strides = [1, 1]} : vector<4x256xf32> to vector<4x32xf32>
    %492 = tpu.concatenate %490, %491 in 1 : vector<4x224xf32>, vector<4x32xf32> -> vector<4x256xf32>
    %c0_i32_135 = arith.constant 0 : i32
    %493 = vector.broadcast %c0_i32_135 : i32 to vector<1x256xi32>
    %494 = arith.cmpi sge, %2, %493 : vector<1x256xi32>
    %c224_i32_136 = arith.constant 224 : i32
    %495 = vector.broadcast %c224_i32_136 : i32 to vector<1x256xi32>
    %496 = arith.cmpi slt, %2, %495 : vector<1x256xi32>
    %497 = arith.andi %494, %496 : vector<1x256xi1>
    %cst_137 = arith.constant 0.000000e+00 : f32
    %498 = vector.shape_cast %497 : vector<1x256xi1> to vector<1x256xi1>
    %499 = vector.broadcast %498 : vector<1x256xi1> to vector<4x256xi1>
    %500 = vector.broadcast %cst_137 : f32 to vector<4x256xf32>
    %501 = arith.select %499, %492, %500 : vector<4x256xi1>, vector<4x256xf32>
    %502 = vector.extract_strided_slice %153 {offsets = [0, 33], sizes = [4, 223], strides = [1, 1]} : vector<4x256xf32> to vector<4x223xf32>
    %503 = vector.extract_strided_slice %153 {offsets = [0, 0], sizes = [4, 33], strides = [1, 1]} : vector<4x256xf32> to vector<4x33xf32>
    %504 = tpu.concatenate %502, %503 in 1 : vector<4x223xf32>, vector<4x33xf32> -> vector<4x256xf32>
    %c0_i32_138 = arith.constant 0 : i32
    %505 = vector.broadcast %c0_i32_138 : i32 to vector<1x256xi32>
    %506 = arith.cmpi sge, %2, %505 : vector<1x256xi32>
    %c224_i32_139 = arith.constant 224 : i32
    %507 = vector.broadcast %c224_i32_139 : i32 to vector<1x256xi32>
    %508 = arith.cmpi slt, %2, %507 : vector<1x256xi32>
    %509 = arith.andi %506, %508 : vector<1x256xi1>
    %c-1_i32_140 = arith.constant -1 : i32
    %510 = vector.broadcast %c-1_i32_140 : i32 to vector<1x256xi32>
    %511 = arith.cmpi sge, %4, %510 : vector<1x256xi32>
    %c15_i32_141 = arith.constant 15 : i32
    %512 = vector.broadcast %c15_i32_141 : i32 to vector<1x256xi32>
    %513 = arith.cmpi slt, %4, %512 : vector<1x256xi32>
    %514 = arith.andi %511, %513 : vector<1x256xi1>
    %515 = arith.andi %509, %514 : vector<1x256xi1>
    %cst_142 = arith.constant 0.000000e+00 : f32
    %516 = vector.shape_cast %515 : vector<1x256xi1> to vector<1x256xi1>
    %517 = vector.broadcast %516 : vector<1x256xi1> to vector<4x256xi1>
    %518 = vector.broadcast %cst_142 : f32 to vector<4x256xf32>
    %519 = arith.select %517, %504, %518 : vector<4x256xi1>, vector<4x256xf32>
    %520 = vector.extract_strided_slice %153 {offsets = [0, 34], sizes = [4, 222], strides = [1, 1]} : vector<4x256xf32> to vector<4x222xf32>
    %521 = vector.extract_strided_slice %153 {offsets = [0, 0], sizes = [4, 34], strides = [1, 1]} : vector<4x256xf32> to vector<4x34xf32>
    %522 = tpu.concatenate %520, %521 in 1 : vector<4x222xf32>, vector<4x34xf32> -> vector<4x256xf32>
    %c0_i32_143 = arith.constant 0 : i32
    %523 = vector.broadcast %c0_i32_143 : i32 to vector<1x256xi32>
    %524 = arith.cmpi sge, %2, %523 : vector<1x256xi32>
    %c224_i32_144 = arith.constant 224 : i32
    %525 = vector.broadcast %c224_i32_144 : i32 to vector<1x256xi32>
    %526 = arith.cmpi slt, %2, %525 : vector<1x256xi32>
    %527 = arith.andi %524, %526 : vector<1x256xi1>
    %c-2_i32_145 = arith.constant -2 : i32
    %528 = vector.broadcast %c-2_i32_145 : i32 to vector<1x256xi32>
    %529 = arith.cmpi sge, %4, %528 : vector<1x256xi32>
    %c14_i32_146 = arith.constant 14 : i32
    %530 = vector.broadcast %c14_i32_146 : i32 to vector<1x256xi32>
    %531 = arith.cmpi slt, %4, %530 : vector<1x256xi32>
    %532 = arith.andi %529, %531 : vector<1x256xi1>
    %533 = arith.andi %527, %532 : vector<1x256xi1>
    %cst_147 = arith.constant 0.000000e+00 : f32
    %534 = vector.shape_cast %533 : vector<1x256xi1> to vector<1x256xi1>
    %535 = vector.broadcast %534 : vector<1x256xi1> to vector<4x256xi1>
    %536 = vector.broadcast %cst_147 : f32 to vector<4x256xf32>
    %537 = arith.select %535, %522, %536 : vector<4x256xi1>, vector<4x256xf32>
    %538 = tpu.concatenate %171, %189, %201, %219, %237, %255, %273, %285, %303, %321, %333, %345, %153, %357, %369, %387 in 0 : vector<4x256xf32>, vector<4x256xf32>, vector<4x256xf32>, vector<4x256xf32>, vector<4x256xf32>, vector<4x256xf32>, vector<4x256xf32>, vector<4x256xf32>, vector<4x256xf32>, vector<4x256xf32>, vector<4x256xf32>, vector<4x256xf32>, vector<4x256xf32>, vector<4x256xf32>, vector<4x256xf32>, vector<4x256xf32> -> vector<64x256xf32>
    %539 = tpu.concatenate %405, %417, %435, %453, %471, %489, %501, %519, %537 in 0 : vector<4x256xf32>, vector<4x256xf32>, vector<4x256xf32>, vector<4x256xf32>, vector<4x256xf32>, vector<4x256xf32>, vector<4x256xf32>, vector<4x256xf32>, vector<4x256xf32> -> vector<36x256xf32>
    %540 = tpu.concatenate %538, %539 in 0 : vector<64x256xf32>, vector<36x256xf32> -> vector<100x256xf32>
    %c0_148 = arith.constant 0 : index
    %c0_149 = arith.constant 0 : index
    %541 = vector.load %arg10[%c0_148, %c0_149] : memref<8x100xf32, #tpu.memory_space<vmem>>, vector<8x100xf32>
    %cst_150 = arith.constant dense<0.000000e+00> : vector<8x256xf32>
    %542 = tpu.matmul %541, %540, %cst_150 {dimension_numbers = #tpu.dot_dimension_numbers<[1], [0], [0], [1], [0, 0, 1, 1], [], []>} : vector<8x100xf32>, vector<100x256xf32>, vector<8x256xf32> -> vector<8x256xf32>
    %c0_151 = arith.constant 0 : index
    %c0_152 = arith.constant 0 : index
    %543 = vector.load %arg11[%c0_151, %c0_152] : memref<8x1xf32, #tpu.memory_space<vmem>>, vector<8x1xf32>
    %544 = vector.broadcast %543 : vector<8x1xf32> to vector<8x256xf32>
    %545 = arith.addf %542, %544 : vector<8x256xf32>
    %cst_153 = arith.constant 0.000000e+00 : f32
    %546 = vector.broadcast %cst_153 : f32 to vector<8x256xf32>
    %547 = arith.maximumf %545, %546 : vector<8x256xf32>
    %548 = vector.extract_strided_slice %1 {offsets = [0, 239], sizes = [4, 17], strides = [1, 1]} : vector<4x256xf32> to vector<4x17xf32>
    %549 = vector.extract_strided_slice %1 {offsets = [0, 0], sizes = [4, 239], strides = [1, 1]} : vector<4x256xf32> to vector<4x239xf32>
    %550 = tpu.concatenate %548, %549 in 1 : vector<4x17xf32>, vector<4x239xf32> -> vector<4x256xf32>
    %c16_i32_154 = arith.constant 16 : i32
    %551 = vector.broadcast %c16_i32_154 : i32 to vector<1x256xi32>
    %552 = arith.cmpi sge, %2, %551 : vector<1x256xi32>
    %c256_i32_155 = arith.constant 256 : i32
    %553 = vector.broadcast %c256_i32_155 : i32 to vector<1x256xi32>
    %554 = arith.cmpi slt, %2, %553 : vector<1x256xi32>
    %555 = arith.andi %552, %554 : vector<1x256xi1>
    %c1_i32_156 = arith.constant 1 : i32
    %556 = vector.broadcast %c1_i32_156 : i32 to vector<1x256xi32>
    %557 = arith.cmpi sge, %4, %556 : vector<1x256xi32>
    %c17_i32_157 = arith.constant 17 : i32
    %558 = vector.broadcast %c17_i32_157 : i32 to vector<1x256xi32>
    %559 = arith.cmpi slt, %4, %558 : vector<1x256xi32>
    %560 = arith.andi %557, %559 : vector<1x256xi1>
    %561 = arith.andi %555, %560 : vector<1x256xi1>
    %cst_158 = arith.constant 0xFF800000 : f32
    %562 = vector.shape_cast %561 : vector<1x256xi1> to vector<1x256xi1>
    %563 = vector.broadcast %562 : vector<1x256xi1> to vector<4x256xi1>
    %564 = vector.broadcast %cst_158 : f32 to vector<4x256xf32>
    %565 = arith.select %563, %550, %564 : vector<4x256xi1>, vector<4x256xf32>
    %566 = arith.maximumf %1, %565 : vector<4x256xf32>
    %567 = vector.extract_strided_slice %1 {offsets = [0, 240], sizes = [4, 16], strides = [1, 1]} : vector<4x256xf32> to vector<4x16xf32>
    %568 = vector.extract_strided_slice %1 {offsets = [0, 0], sizes = [4, 240], strides = [1, 1]} : vector<4x256xf32> to vector<4x240xf32>
    %569 = tpu.concatenate %567, %568 in 1 : vector<4x16xf32>, vector<4x240xf32> -> vector<4x256xf32>
    %c16_i32_159 = arith.constant 16 : i32
    %570 = vector.broadcast %c16_i32_159 : i32 to vector<1x256xi32>
    %571 = arith.cmpi sge, %2, %570 : vector<1x256xi32>
    %c256_i32_160 = arith.constant 256 : i32
    %572 = vector.broadcast %c256_i32_160 : i32 to vector<1x256xi32>
    %573 = arith.cmpi slt, %2, %572 : vector<1x256xi32>
    %574 = arith.andi %571, %573 : vector<1x256xi1>
    %cst_161 = arith.constant 0xFF800000 : f32
    %575 = vector.shape_cast %574 : vector<1x256xi1> to vector<1x256xi1>
    %576 = vector.broadcast %575 : vector<1x256xi1> to vector<4x256xi1>
    %577 = vector.broadcast %cst_161 : f32 to vector<4x256xf32>
    %578 = arith.select %576, %569, %577 : vector<4x256xi1>, vector<4x256xf32>
    %579 = arith.maximumf %566, %578 : vector<4x256xf32>
    %580 = vector.extract_strided_slice %1 {offsets = [0, 241], sizes = [4, 15], strides = [1, 1]} : vector<4x256xf32> to vector<4x15xf32>
    %581 = vector.extract_strided_slice %1 {offsets = [0, 0], sizes = [4, 241], strides = [1, 1]} : vector<4x256xf32> to vector<4x241xf32>
    %582 = tpu.concatenate %580, %581 in 1 : vector<4x15xf32>, vector<4x241xf32> -> vector<4x256xf32>
    %c16_i32_162 = arith.constant 16 : i32
    %583 = vector.broadcast %c16_i32_162 : i32 to vector<1x256xi32>
    %584 = arith.cmpi sge, %2, %583 : vector<1x256xi32>
    %c256_i32_163 = arith.constant 256 : i32
    %585 = vector.broadcast %c256_i32_163 : i32 to vector<1x256xi32>
    %586 = arith.cmpi slt, %2, %585 : vector<1x256xi32>
    %587 = arith.andi %584, %586 : vector<1x256xi1>
    %c-1_i32_164 = arith.constant -1 : i32
    %588 = vector.broadcast %c-1_i32_164 : i32 to vector<1x256xi32>
    %589 = arith.cmpi sge, %4, %588 : vector<1x256xi32>
    %c15_i32_165 = arith.constant 15 : i32
    %590 = vector.broadcast %c15_i32_165 : i32 to vector<1x256xi32>
    %591 = arith.cmpi slt, %4, %590 : vector<1x256xi32>
    %592 = arith.andi %589, %591 : vector<1x256xi1>
    %593 = arith.andi %587, %592 : vector<1x256xi1>
    %cst_166 = arith.constant 0xFF800000 : f32
    %594 = vector.shape_cast %593 : vector<1x256xi1> to vector<1x256xi1>
    %595 = vector.broadcast %594 : vector<1x256xi1> to vector<4x256xi1>
    %596 = vector.broadcast %cst_166 : f32 to vector<4x256xf32>
    %597 = arith.select %595, %582, %596 : vector<4x256xi1>, vector<4x256xf32>
    %598 = arith.maximumf %579, %597 : vector<4x256xf32>
    %599 = vector.extract_strided_slice %1 {offsets = [0, 255], sizes = [4, 1], strides = [1, 1]} : vector<4x256xf32> to vector<4x1xf32>
    %600 = vector.extract_strided_slice %1 {offsets = [0, 0], sizes = [4, 255], strides = [1, 1]} : vector<4x256xf32> to vector<4x255xf32>
    %601 = tpu.concatenate %599, %600 in 1 : vector<4x1xf32>, vector<4x255xf32> -> vector<4x256xf32>
    %c1_i32_167 = arith.constant 1 : i32
    %602 = vector.broadcast %c1_i32_167 : i32 to vector<1x256xi32>
    %603 = arith.cmpi sge, %4, %602 : vector<1x256xi32>
    %c17_i32_168 = arith.constant 17 : i32
    %604 = vector.broadcast %c17_i32_168 : i32 to vector<1x256xi32>
    %605 = arith.cmpi slt, %4, %604 : vector<1x256xi32>
    %606 = arith.andi %603, %605 : vector<1x256xi1>
    %cst_169 = arith.constant 0xFF800000 : f32
    %607 = vector.shape_cast %606 : vector<1x256xi1> to vector<1x256xi1>
    %608 = vector.broadcast %607 : vector<1x256xi1> to vector<4x256xi1>
    %609 = vector.broadcast %cst_169 : f32 to vector<4x256xf32>
    %610 = arith.select %608, %601, %609 : vector<4x256xi1>, vector<4x256xf32>
    %611 = arith.maximumf %598, %610 : vector<4x256xf32>
    %612 = vector.extract_strided_slice %1 {offsets = [0, 1], sizes = [4, 255], strides = [1, 1]} : vector<4x256xf32> to vector<4x255xf32>
    %613 = vector.extract_strided_slice %1 {offsets = [0, 0], sizes = [4, 1], strides = [1, 1]} : vector<4x256xf32> to vector<4x1xf32>
    %614 = tpu.concatenate %612, %613 in 1 : vector<4x255xf32>, vector<4x1xf32> -> vector<4x256xf32>
    %c-1_i32_170 = arith.constant -1 : i32
    %615 = vector.broadcast %c-1_i32_170 : i32 to vector<1x256xi32>
    %616 = arith.cmpi sge, %4, %615 : vector<1x256xi32>
    %c15_i32_171 = arith.constant 15 : i32
    %617 = vector.broadcast %c15_i32_171 : i32 to vector<1x256xi32>
    %618 = arith.cmpi slt, %4, %617 : vector<1x256xi32>
    %619 = arith.andi %616, %618 : vector<1x256xi1>
    %cst_172 = arith.constant 0xFF800000 : f32
    %620 = vector.shape_cast %619 : vector<1x256xi1> to vector<1x256xi1>
    %621 = vector.broadcast %620 : vector<1x256xi1> to vector<4x256xi1>
    %622 = vector.broadcast %cst_172 : f32 to vector<4x256xf32>
    %623 = arith.select %621, %614, %622 : vector<4x256xi1>, vector<4x256xf32>
    %624 = arith.maximumf %611, %623 : vector<4x256xf32>
    %625 = vector.extract_strided_slice %1 {offsets = [0, 15], sizes = [4, 241], strides = [1, 1]} : vector<4x256xf32> to vector<4x241xf32>
    %626 = vector.extract_strided_slice %1 {offsets = [0, 0], sizes = [4, 15], strides = [1, 1]} : vector<4x256xf32> to vector<4x15xf32>
    %627 = tpu.concatenate %625, %626 in 1 : vector<4x241xf32>, vector<4x15xf32> -> vector<4x256xf32>
    %c0_i32_173 = arith.constant 0 : i32
    %628 = vector.broadcast %c0_i32_173 : i32 to vector<1x256xi32>
    %629 = arith.cmpi sge, %2, %628 : vector<1x256xi32>
    %c240_i32_174 = arith.constant 240 : i32
    %630 = vector.broadcast %c240_i32_174 : i32 to vector<1x256xi32>
    %631 = arith.cmpi slt, %2, %630 : vector<1x256xi32>
    %632 = arith.andi %629, %631 : vector<1x256xi1>
    %c1_i32_175 = arith.constant 1 : i32
    %633 = vector.broadcast %c1_i32_175 : i32 to vector<1x256xi32>
    %634 = arith.cmpi sge, %4, %633 : vector<1x256xi32>
    %c17_i32_176 = arith.constant 17 : i32
    %635 = vector.broadcast %c17_i32_176 : i32 to vector<1x256xi32>
    %636 = arith.cmpi slt, %4, %635 : vector<1x256xi32>
    %637 = arith.andi %634, %636 : vector<1x256xi1>
    %638 = arith.andi %632, %637 : vector<1x256xi1>
    %cst_177 = arith.constant 0xFF800000 : f32
    %639 = vector.shape_cast %638 : vector<1x256xi1> to vector<1x256xi1>
    %640 = vector.broadcast %639 : vector<1x256xi1> to vector<4x256xi1>
    %641 = vector.broadcast %cst_177 : f32 to vector<4x256xf32>
    %642 = arith.select %640, %627, %641 : vector<4x256xi1>, vector<4x256xf32>
    %643 = arith.maximumf %624, %642 : vector<4x256xf32>
    %644 = vector.extract_strided_slice %1 {offsets = [0, 16], sizes = [4, 240], strides = [1, 1]} : vector<4x256xf32> to vector<4x240xf32>
    %645 = vector.extract_strided_slice %1 {offsets = [0, 0], sizes = [4, 16], strides = [1, 1]} : vector<4x256xf32> to vector<4x16xf32>
    %646 = tpu.concatenate %644, %645 in 1 : vector<4x240xf32>, vector<4x16xf32> -> vector<4x256xf32>
    %c0_i32_178 = arith.constant 0 : i32
    %647 = vector.broadcast %c0_i32_178 : i32 to vector<1x256xi32>
    %648 = arith.cmpi sge, %2, %647 : vector<1x256xi32>
    %c240_i32_179 = arith.constant 240 : i32
    %649 = vector.broadcast %c240_i32_179 : i32 to vector<1x256xi32>
    %650 = arith.cmpi slt, %2, %649 : vector<1x256xi32>
    %651 = arith.andi %648, %650 : vector<1x256xi1>
    %cst_180 = arith.constant 0xFF800000 : f32
    %652 = vector.shape_cast %651 : vector<1x256xi1> to vector<1x256xi1>
    %653 = vector.broadcast %652 : vector<1x256xi1> to vector<4x256xi1>
    %654 = vector.broadcast %cst_180 : f32 to vector<4x256xf32>
    %655 = arith.select %653, %646, %654 : vector<4x256xi1>, vector<4x256xf32>
    %656 = arith.maximumf %643, %655 : vector<4x256xf32>
    %657 = vector.extract_strided_slice %1 {offsets = [0, 17], sizes = [4, 239], strides = [1, 1]} : vector<4x256xf32> to vector<4x239xf32>
    %658 = vector.extract_strided_slice %1 {offsets = [0, 0], sizes = [4, 17], strides = [1, 1]} : vector<4x256xf32> to vector<4x17xf32>
    %659 = tpu.concatenate %657, %658 in 1 : vector<4x239xf32>, vector<4x17xf32> -> vector<4x256xf32>
    %c0_i32_181 = arith.constant 0 : i32
    %660 = vector.broadcast %c0_i32_181 : i32 to vector<1x256xi32>
    %661 = arith.cmpi sge, %2, %660 : vector<1x256xi32>
    %c240_i32_182 = arith.constant 240 : i32
    %662 = vector.broadcast %c240_i32_182 : i32 to vector<1x256xi32>
    %663 = arith.cmpi slt, %2, %662 : vector<1x256xi32>
    %664 = arith.andi %661, %663 : vector<1x256xi1>
    %c-1_i32_183 = arith.constant -1 : i32
    %665 = vector.broadcast %c-1_i32_183 : i32 to vector<1x256xi32>
    %666 = arith.cmpi sge, %4, %665 : vector<1x256xi32>
    %c15_i32_184 = arith.constant 15 : i32
    %667 = vector.broadcast %c15_i32_184 : i32 to vector<1x256xi32>
    %668 = arith.cmpi slt, %4, %667 : vector<1x256xi32>
    %669 = arith.andi %666, %668 : vector<1x256xi1>
    %670 = arith.andi %664, %669 : vector<1x256xi1>
    %cst_185 = arith.constant 0xFF800000 : f32
    %671 = vector.shape_cast %670 : vector<1x256xi1> to vector<1x256xi1>
    %672 = vector.broadcast %671 : vector<1x256xi1> to vector<4x256xi1>
    %673 = vector.broadcast %cst_185 : f32 to vector<4x256xf32>
    %674 = arith.select %672, %659, %673 : vector<4x256xi1>, vector<4x256xf32>
    %675 = arith.maximumf %656, %674 : vector<4x256xf32>
    %c0_186 = arith.constant 0 : index
    %c0_187 = arith.constant 0 : index
    %676 = vector.load %arg12[%c0_186, %c0_187] : memref<8x4xf32, #tpu.memory_space<vmem>>, vector<8x4xf32>
    %cst_188 = arith.constant dense<0.000000e+00> : vector<8x256xf32>
    %677 = tpu.matmul %676, %675, %cst_188 {dimension_numbers = #tpu.dot_dimension_numbers<[1], [0], [0], [1], [0, 0, 1, 1], [], []>} : vector<8x4xf32>, vector<4x256xf32>, vector<8x256xf32> -> vector<8x256xf32>
    %c0_189 = arith.constant 0 : index
    %c0_190 = arith.constant 0 : index
    %678 = vector.load %arg13[%c0_189, %c0_190] : memref<8x1xf32, #tpu.memory_space<vmem>>, vector<8x1xf32>
    %679 = vector.broadcast %678 : vector<8x1xf32> to vector<8x256xf32>
    %680 = arith.addf %677, %679 : vector<8x256xf32>
    %cst_191 = arith.constant 0.000000e+00 : f32
    %681 = vector.broadcast %cst_191 : f32 to vector<8x256xf32>
    %682 = arith.maximumf %680, %681 : vector<8x256xf32>
    %c0_192 = arith.constant 0 : index
    %c0_193 = arith.constant 0 : index
    %c0_194 = arith.constant 0 : index
    %683 = vector.load %arg14[%c0_192, %c0_193, %c0_194] : memref<1x40x256xf32, #tpu.memory_space<vmem>>, vector<1x8x256xf32>
    %684 = vector.shape_cast %683 : vector<1x8x256xf32> to vector<8x256xf32>
    %685 = vector.shape_cast %11 : vector<8x256xf32> to vector<1x8x256xf32>
    tpu.vector_store %arg14[%c0_192, %c0_193, %c0_194], %685 {strides = array<i32>} : memref<1x40x256xf32, #tpu.memory_space<vmem>>, vector<1x8x256xf32>,
    %c0_195 = arith.constant 0 : index
    %c8 = arith.constant 8 : index
    %c0_196 = arith.constant 0 : index
    %686 = vector.load %arg14[%c0_195, %c8, %c0_196] : memref<1x40x256xf32, #tpu.memory_space<vmem>>, vector<1x16x256xf32>
    %687 = vector.shape_cast %686 : vector<1x16x256xf32> to vector<16x256xf32>
    %688 = vector.shape_cast %146 : vector<16x256xf32> to vector<1x16x256xf32>
    tpu.vector_store %arg14[%c0_195, %c8, %c0_196], %688 {strides = array<i32>} : memref<1x40x256xf32, #tpu.memory_space<vmem>>, vector<1x16x256xf32>,
    %c0_197 = arith.constant 0 : index
    %c24 = arith.constant 24 : index
    %c0_198 = arith.constant 0 : index
    %689 = vector.load %arg14[%c0_197, %c24, %c0_198] : memref<1x40x256xf32, #tpu.memory_space<vmem>>, vector<1x8x256xf32>
    %690 = vector.shape_cast %689 : vector<1x8x256xf32> to vector<8x256xf32>
    %691 = vector.shape_cast %547 : vector<8x256xf32> to vector<1x8x256xf32>
    tpu.vector_store %arg14[%c0_197, %c24, %c0_198], %691 {strides = array<i32>} : memref<1x40x256xf32, #tpu.memory_space<vmem>>, vector<1x8x256xf32>,
    %c0_199 = arith.constant 0 : index
    %c32 = arith.constant 32 : index
    %c0_200 = arith.constant 0 : index
    %692 = vector.load %arg14[%c0_199, %c32, %c0_200] : memref<1x40x256xf32, #tpu.memory_space<vmem>>, vector<1x8x256xf32>
    %693 = vector.shape_cast %692 : vector<1x8x256xf32> to vector<8x256xf32>
    %694 = vector.shape_cast %682 : vector<8x256xf32> to vector<1x8x256xf32>
    tpu.vector_store %arg14[%c0_199, %c32, %c0_200], %694 {strides = array<i32>} : memref<1x40x256xf32, #tpu.memory_space<vmem>>, vector<1x8x256xf32>,
    return
  }
  func.func @transform_0(%arg0: i32) -> (i32, i32, i32) {
    %c0_i32 = arith.constant 0 : i32
    %c0_i32_0 = arith.constant 0 : i32
    %c0_i32_1 = arith.constant 0 : i32
    return %arg0, %c0_i32, %c0_i32_0 : i32, i32, i32
  }
  func.func @transform_1(%arg0: i32) -> (i32, i32) {
    %c0_i32 = arith.constant 0 : i32
    %c0_i32_0 = arith.constant 0 : i32
    %c0_i32_1 = arith.constant 0 : i32
    return %c0_i32, %c0_i32_0 : i32, i32
  }
  func.func @transform_2(%arg0: i32) -> (i32, i32) {
    %c0_i32 = arith.constant 0 : i32
    %c0_i32_0 = arith.constant 0 : i32
    %c0_i32_1 = arith.constant 0 : i32
    return %c0_i32, %c0_i32_0 : i32, i32
  }
  func.func @transform_3(%arg0: i32) -> (i32, i32) {
    %c0_i32 = arith.constant 0 : i32
    %c0_i32_0 = arith.constant 0 : i32
    %c0_i32_1 = arith.constant 0 : i32
    return %c0_i32, %c0_i32_0 : i32, i32
  }
  func.func @transform_4(%arg0: i32) -> (i32, i32) {
    %c0_i32 = arith.constant 0 : i32
    %c0_i32_0 = arith.constant 0 : i32
    %c0_i32_1 = arith.constant 0 : i32
    return %c0_i32, %c0_i32_0 : i32, i32
  }
  func.func @transform_5(%arg0: i32) -> (i32, i32) {
    %c0_i32 = arith.constant 0 : i32
    %c0_i32_0 = arith.constant 0 : i32
    %c0_i32_1 = arith.constant 0 : i32
    return %c0_i32, %c0_i32_0 : i32, i32
  }
  func.func @transform_6(%arg0: i32) -> (i32, i32) {
    %c0_i32 = arith.constant 0 : i32
    %c0_i32_0 = arith.constant 0 : i32
    %c0_i32_1 = arith.constant 0 : i32
    return %c0_i32, %c0_i32_0 : i32, i32
  }
  func.func @transform_7(%arg0: i32) -> (i32, i32) {
    %c0_i32 = arith.constant 0 : i32
    %c0_i32_0 = arith.constant 0 : i32
    %c0_i32_1 = arith.constant 0 : i32
    return %c0_i32, %c0_i32_0 : i32, i32
  }
  func.func @transform_8(%arg0: i32) -> (i32, i32) {
    %c0_i32 = arith.constant 0 : i32
    %c0_i32_0 = arith.constant 0 : i32
    %c0_i32_1 = arith.constant 0 : i32
    return %c0_i32, %c0_i32_0 : i32, i32
  }
  func.func @transform_9(%arg0: i32) -> (i32, i32) {
    %c0_i32 = arith.constant 0 : i32
    %c0_i32_0 = arith.constant 0 : i32
    %c0_i32_1 = arith.constant 0 : i32
    return %c0_i32, %c0_i32_0 : i32, i32
  }
  func.func @transform_10(%arg0: i32) -> (i32, i32) {
    %c0_i32 = arith.constant 0 : i32
    %c0_i32_0 = arith.constant 0 : i32
    %c0_i32_1 = arith.constant 0 : i32
    return %c0_i32, %c0_i32_0 : i32, i32
  }
  func.func @transform_11(%arg0: i32) -> (i32, i32) {
    %c0_i32 = arith.constant 0 : i32
    %c0_i32_0 = arith.constant 0 : i32
    %c0_i32_1 = arith.constant 0 : i32
    return %c0_i32, %c0_i32_0 : i32, i32
  }
  func.func @transform_12(%arg0: i32) -> (i32, i32) {
    %c0_i32 = arith.constant 0 : i32
    %c0_i32_0 = arith.constant 0 : i32
    %c0_i32_1 = arith.constant 0 : i32
    return %c0_i32, %c0_i32_0 : i32, i32
  }
  func.func @transform_13(%arg0: i32) -> (i32, i32, i32) {
    %c0_i32 = arith.constant 0 : i32
    %c0_i32_0 = arith.constant 0 : i32
    %c0_i32_1 = arith.constant 0 : i32
    return %arg0, %c0_i32, %c0_i32_0 : i32, i32, i32
  }
}

</mosaic_0001>

<bundles_post_ra>
// kernel: inception_forward.1
= control target key start
LH: loop header
LB: loop body
LE: loop exit
PB: predicated region body
PF: predicated region fallthrough
CT: control target
= control target key end

     0   :  { %s2210_s25 = smov 0   ;;  %s2879_s0 = inlined_call_operand.vmem [shape: f32[2,4,256], index: 0, kind: input, shape index: {}]   ;;  %s2880_s1 = inlined_call_operand.vmem [shape: f32[8,4], index: 1, kind: input, shape index: {}]   ;;  %s2881_s2 = inlined_call_operand.vmem [shape: f32[8,1], index: 2, kind: input, shape index: {}]   ;;  %s2882_s3 = inlined_call_operand.vmem [shape: f32[8,4], index: 3, kind: input, shape index: {}]   ;;  %s2883_s4 = inlined_call_operand.vmem [shape: f32[8,1], index: 4, kind: input, shape index: {}]   ;;  %s2884_s5 = inlined_call_operand.vmem [shape: f32[16,72], index: 5, kind: input, shape index: {}]   ;;  %s2885_s6 = inlined_call_operand.vmem [shape: f32[16,1], index: 6, kind: input, shape index: {}]   ;;  %s2886_s7 = inlined_call_operand.vmem [shape: f32[4,4], index: 7, kind: input, shape index: {}]   ;;  %s2887_s8 = inlined_call_operand.vmem [shape: f32[4,1], index: 8, kind: input, shape index: {}]   ;;  %s2888_s9 = inlined_call_operand.vmem [shape: f32[8,100], index: 9, kind: input, shape index: {}]   ;;  %s2889_s10 = inlined_call_operand.vmem [shape: f32[8,1], index: 10, kind: input, shape index: {}]   ;;  %s2890_s11 = inlined_call_operand.vmem [shape: f32[8,4], index: 11, kind: input, shape index: {}]   ;;  %s2891_s12 = inlined_call_operand.vmem [shape: f32[8,1], index: 12, kind: input, shape index: {}]   ;;  %s2892_s13 = inlined_call_operand.vmem [shape: f32[2,40,256], index: 13, kind: output, shape index: {}]  }
   0x1 LB: > { %s1826_s26 = sadd.s32 4294967295, %s2111_s25   ;;  %p1830_p0 = scmp.ge.s32.totalorder %s2111_s25, 1  ;;  %s2111_s25 = sphi %s2210_s25, %s23_s25  }
   0x2   : > { %p387_p1 = scmp.lt.s32.totalorder %s2111_s25, 3 }
   0x4   : > { %p388_p2 = pnand %p1830_p0, %p387_p1 }
   0x5   : > { %p431_p3 = scmp.lt.s32.totalorder (!%p388_p2), %s1826_s26, 1  ;;  %v2113_v0 = vmov (!%p388_p2), 0.0   ;;  %v2114_v1 = vmov (!%p388_p2), 0   ;;  %v886_v2 = vld [vmem:[%s2887_s8] sm:$0xf] (!%p388_p2)  ;;  %vm2894_vm0 = vcmask (!%p388_p2), 1043456   ;;  %v442_v12 = vlaneseq (!%p388_p2) }
   0x6   : > { %391 = sbr.rel (%p388_p2) target bundleno = 664 (0x298), region = 72  ;;  %612 = vmatprep.mubr.f32.mxu1 (!%p388_p2), %v2113_v0  ;;  %1952 = vset.pattern.permute.xlu0 (!%p388_p2), %v2114_v1  ;;  %v539_v3 = vld [vmem:[%s2883_s4] sm:$0xff] (!%p388_p2)  ;;  %s2115_s18 = smov (!%p388_p2), 17   ;;  %vm2893_vm1 = vcmask (!%p388_p2), 31744   ;;  %vm2897_vm2 = vcmask (!%p388_p2), 138240   ;;  %vm2896_vm3 = vcmask (!%p388_p2), 130048  }
   0x7   : > { %889 = vperm.xlu0 (!%p388_p2), %1952, %v886_v2   ;;  %529 = vmatprep.mubr.f32.mxu0 (!%p388_p2), %v2113_v0  ;;  %v538_v6 = vld [vmem:[%s2882_s3] sm:$0xff] (!%p388_p2)  ;;  %s2116_s27 = smov (!%p388_p2), 16   ;;  %s2117_s28 = smov (!%p388_p2), 15   ;;  %v2299_v16 = vand.u32 (!%p388_p2), 127, %v442_v12  ;;  %vm2899_vm5 = vcmask (!%p388_p2), 121856   ;;  %vm2898_vm12 = vcmask (!%p388_p2), 7168  }
   0x8   : > { %2103 = vset.pattern.permute.xlu1 (!%p388_p2), %v2114_v1  ;;  %v447_v7 = vld [vmem:[%s2880_s1] sm:$0xff] (!%p388_p2)  ;;  %s2118_s29 = smov (!%p388_p2), 1   ;;  %s2119_s30 = smov (!%p388_p2), 127   ;;  %vm2900_vm13 = vcmask (!%p388_p2), 1039360   ;;  %vm2895_vm15 = vcmask (!%p388_p2), 924672  }
   0x9   : > { %v885_v8 = vld [vmem:[%s2886_s7] sm:$0xf] (!%p388_p2)  ;;  %s2121_s15 = smov (!%p388_p2), 112   ;;  %v2302_v17 = vadd.s32 (!%p388_p2), 128, %v2299_v16  ;;  %v2305_v18 = vand.u32 (!%p388_p2), 15, %v2299_v16  ;;  %vm2901_vm4 = vcmp.ge.s32.totalorder (!%p388_p2), %v2299_v16, 16 }
   0xa   : > { %s2122_s16 = smov (!%p388_p2), 111   ;;  %s2124_s19 = smov (!%p388_p2), 34  }
   0xb   : > { %542 = vperm.xlu0 (!%p388_p2), %1952, %v539_v3   ;;  %v2311_v23 = vand.u32 (!%p388_p2), 15, %v2302_v17  ;;  %vm2905_vm6 = vcmp.ge.s32.totalorder (!%p388_p2), %v2305_v18, 1  ;;  %vm2902_vm7 = vcmp.lt.s32.totalorder (!%p388_p2), %v2305_v18, 15  ;;  %vm2907_vm14 = vcmp.lt.s32.totalorder (!%p388_p2), %v2302_v17, 240  ;;  %s2125_s20 = smov (!%p388_p2), 31   ;;  %s2126_s21 = smov (!%p388_p2), 18  }
   0xc   : > { %vm2321_vm8 = vmand (!%p388_p2), %vm2901_vm4, %vm2905_vm6  ;;  %s2127_s22 = smov (!%p388_p2), 32   ;;  %s2128_s23 = smov (!%p388_p2), 30  }
   0xd   : > { %s3021_s26 = smov (!%p431_p3, %s1826_s26), 1  ;;  %vm2903_vm9 = vcmp.ge.s32.totalorder %v2311_v23, 1  ;;  %vm2906_vm10 = vcmp.lt.s32.totalorder %v2311_v23, 15  ;;  %vm2333_vm11 = vmand %vm2901_vm4, %vm2902_vm7  ;;  %s2129_s24 = smov 14  }
   0xe   : > { %s1867_s14 = sshll.u32 %s3021_s26, 3 }
   0xf   : > { %s435_s17 = scalar_lea.vmem %s2879_s0, %s1867_s14  ;;  %s2120_s14 = smov 113  }
  0x10   : > { %v2232_v4 = vld [vmem:[%s435_s17] sm:$0xff]  ;;  %s2123_s17 = smov 33  }
  0x11   : > { %v2236_v5 = vcombine.high %v2232_v4, %v2232_v4  ;;  %1547 = vrot.lane.b32.xlu1 %v2232_v4, %s2115_s18 }
  0x13   : > { %1837 = vmatprep.subr.msk.mxu1 %vm2894_vm0, %v2236_v5  ;;  %1834 = vmatprep.subr.msk.mxu0 %vm2894_vm0, %v2236_v5 }
  0x14   : > { %1838 = vmatpush1.msk.msra.mxu1 %vm2894_vm0, %v2232_v4  ;;  %1544 = vrot.lane.b32.xlu0 %v2236_v5, %s2115_s18 }
  0x15   : > { %1839 = vmatmul.mubr.msk.f32.vlgmr.msra.gmra.mrb[0].mxu1 %vm2893_vm1, %v538_v6  ;;  %1856 = vmatprep.subr.msk.mxu1 %vm2894_vm0, %v2236_v5 }
  0x16   : > { %1857 = vmatpush1.msk.msra.mxu1 %vm2894_vm0, %v2232_v4  ;;  %959 = vmatprep.mubr.f32.mxu1 %v2113_v0 }
  0x17   : > { %1563 = vrot.lane.b32.xlu1 %v2232_v4, %s2116_s27  ;;  %1835 = vmatpush1.msk.msra.mxu0 %vm2894_vm0, %v2232_v4  ;;  %vm2139_vm0 = vmmov 1  }
  0x18   : > { %1560 = vrot.lane.b32.xlu0 %v2236_v5, %s2116_s27  ;;  %1836 = vmatmul.mubr.msk.f32.vlgmr.msra.gmra.mrb[0].mxu0 %vm2893_vm1, %v447_v7 }
  0x19   : > { %1858 = vmatmul.mubr.msk.f32.vlgmr.msra.gmra.mrb[2].mxu1 %vm2893_vm1, %v885_v8  ;;  %868 = vmatprep.mubr.f32.mxu0 %v2113_v0  ;;  %vm2363_vm1 = vmand %vm2907_vm14, %vm2903_vm9 }
  0x1a   : > { %1535 = vmatprep.mubr.f32.mxu1 %v2113_v0 }
  0x1b   : > { %1576 = vrot.lane.b32.xlu1 %v2236_v5, %s2117_s28 }
  0x1c   : > { %1579 = vrot.lane.b32.xlu0 %v2232_v4, %s2117_s28 }
  0x1f   : > { %1595 = vrot.lane.b32.xlu1 %v2232_v4, %s2118_s29 }
  0x20   : > { %1592 = vrot.lane.b32.xlu0 %v2236_v5, %s2118_s29 }
  0x23   : > { %1610 = vrot.lane.b32.xlu1 %v2236_v5, %s2119_s30 }
  0x24   : > { %1608 = vrot.lane.b32.xlu0 %v2232_v4, %s2119_s30 }
  0x27   : > { %1626 = vrot.lane.b32.xlu1 %v2236_v5, %s2120_s14 }
  0x28   : > { %1624 = vrot.lane.b32.xlu0 %v2232_v4, %s2120_s14 }
  0x2b   : > { %1642 = vrot.lane.b32.xlu1 %v2236_v5, %s2121_s15 }
  0x2c   : > { %1640 = vrot.lane.b32.xlu0 %v2232_v4, %s2121_s15 }
  0x83   : > { %v1548_v11 = vpop.permute.xlu1 %1547 }
  0x86   : > { %v2293_v9 = vpop.permute.xlu0 %889 }
  0x89   : > { %v1564_v19 = vpop.permute.xlu1 %1563 }
  0x8a   : > { %v2295_v10 = vpop.permute.xlu0 %542 }
  0x8d   : > { %v1577_v28 = vpop.permute.xlu1 %1576 }
  0x8e   : > { %v1545_v13 = vpop.permute.xlu0 %1544 }
  0x8f   : > { %v1549_v14 = vsel %vm2897_vm2, %v1548_v11, %v1545_v13  ;;  %v1552_v15 = vsel %vm2897_vm2, %v1545_v13, %v1548_v11 }
  0x90   : > { %v1553_v27 = vsel %vm2321_vm8, %v1552_v15, -inf  ;;  %v1554_v31 = vsel %vm2903_vm9, %v1549_v14, -inf }
  0x91   : > { %v1557_v34 = vcombine.low %v1553_v27, %v1554_v31  ;;  %v1596_v39 = vpop.permute.xlu1 %1595  ;;  %v448_v27 = vld [vmem:[%s2881_s2] sm:$0xff] }
  0x92   : > { %v1561_v20 = vpop.permute.xlu0 %1560  ;;  %v785_v31 = vld [vmem:[%s2885_s6] sm:$0xff] }
  0x93   : > { %v1565_v21 = vsel %vm2896_vm3, %v1564_v19, %v1561_v20  ;;  %v1568_v22 = vsel %vm2896_vm3, %v1561_v20, %v1564_v19  ;;  %v1559_v38 = vmax.f32 %v2232_v4, %v1557_v34 }
  0x94   : > { %v1569_v24 = vsel %vm2901_vm4, %v1568_v22, -inf }
  0x95   : > { %v1573_v26 = vcombine.low %v1569_v24, %v1565_v21  ;;  %v1611_v48 = vpop.permute.xlu1 %1610 }
  0x96   : > { %v1580_v30 = vpop.permute.xlu0 %1579 }
  0x97   : > { %v1581_v32 = vsel %vm2899_vm5, %v1580_v30, %v1577_v28  ;;  %v1584_v33 = vsel %vm2899_vm5, %v1577_v28, %v1580_v30  ;;  %v1575_v43 = vmax.f32 %v1559_v38, %v1573_v26  ;;  %v786_v28 = vld [vmem:[%s2885_s6 + $0x8] sm:$0xff]  ;;  %v1673_v30 = vld [vmem:[%s2891_s12] sm:$0xff] }
  0x98   : > { %v1585_v35 = vsel %vm2333_vm11, %v1584_v33, -inf  ;;  %v1586_v36 = vsel %vm2906_vm10, %v1581_v32, -inf  ;;  %v1455_v32 = vld [vmem:[%s2889_s10] sm:$0xff] }
  0x99   : > { %v1589_v37 = vcombine.low %v1585_v35, %v1586_v36  ;;  %v1627_v57 = vpop.permute.xlu1 %1626 }
  0x9a   : > { %v1593_v40 = vpop.permute.xlu0 %1592 }
  0x9b   : > { %v1597_v41 = vsel %vm2898_vm12, %v1596_v39, %v1593_v40  ;;  %v1600_v42 = vsel %vm2898_vm12, %v1593_v40, %v1596_v39  ;;  %v1591_v47 = vmax.f32 %v1575_v43, %v1589_v37 }
  0x9c   : > { %v1601_v44 = vsel %vm2905_vm6, %v1600_v42, -inf  ;;  %v1602_v45 = vsel %vm2903_vm9, %v1597_v41, -inf }
  0x9d   : > { %v1605_v46 = vcombine.low %v1601_v44, %v1602_v45  ;;  %v2445_v33 = vpop.permute.xlu1 %1642 }
  0x9e   : > { %v1609_v49 = vpop.permute.xlu0 %1608 }
  0x9f   : > { %v1612_v50 = vsel %vm2900_vm13, %v1609_v49, %v1611_v48  ;;  %v1616_v51 = vsel %vm2900_vm13, %v1611_v48, %v1609_v49  ;;  %v1607_v52 = vmax.f32 %v1591_v47, %v1605_v46 }
  0xa0   : > { %v1617_v53 = vsel %vm2902_vm7, %v1612_v50, -inf  ;;  %v1618_v54 = vsel %vm2906_vm10, %v1616_v51, -inf }
  0xa1   : > { %v1621_v55 = vcombine.low %v1617_v53, %v1618_v54 }
  0xa2   : > { %v1625_v58 = vpop.permute.xlu0 %1624 }
  0xa3   : > { %v2367_v59 = vmax.f32 %v1607_v52, %v1621_v55  ;;  %v1628_v60 = vsel %vm2895_vm15, %v1625_v58, %v1627_v57  ;;  %v1632_v61 = vsel %vm2895_vm15, %v1627_v57, %v1625_v58  ;;  %vm1869_vm15 = vmpackc.low %vm2139_vm0, %vm2903_vm9 }
  0xa4   : > { %v1633_v62 = vsel %vm2905_vm6, %v1628_v60, -inf  ;;  %v1634_v63 = vsel %vm2363_vm1, %v1632_v61, -inf }
  0xa5   : > { %v2375_v1 = vcombine.low %v1633_v62, %v1634_v63 }
  0xa7   : > { %v1639_v2 = vmax.f32 %v2367_v59, %v2375_v1  ;;  %v1672_v1 = vld [vmem:[%s2890_s11] sm:$0xff] }
  0xe8   : > { %v614_v3 = vpop.f32.mrb[0].mxu1 }
  0xe9   : > { %v615_v6 = vadd.f32 %v614_v3, %v2295_v10  ;;  %v616_v7 = vpop.f32.mrb[1].mxu1 }
  0xea   : > { %v617_v8 = vadd.f32 %v616_v7, %v2295_v10 }
  0xeb   : > { %v2381_v11 = vmax.f32 %v615_v6, 0.0  ;;  %v2421_v26 = vpop.f32.mrb[0].mxu0 }
  0xec   : > { %v2383_v12 = vmax.f32 %v617_v8, 0.0  ;;  %v961_v13 = vpop.f32.mrb[2].mxu1 }
  0xed   : > { %v963_v14 = vpop.f32.mrb[3].mxu1  ;;  %765 = vrot.lane.b32.xlu0 %v2381_v11, %s2122_s16  ;;  %v962_v10 = vadd.f32 %v961_v13, %v2293_v9 }
  0xee   : > { %v1958_v15 = vpack.i.bf16 %v2381_v11, %v2383_v12  ;;  %v964_v19 = vadd.f32 %v963_v14, %v2293_v9  ;;  %v1983_v20 = vpack.i.bf16 %v2383_v12, %v2381_v11 }
  0xef   : > { %v2399_v21 = vmax.f32 %v962_v10, 0.0 }
  0xf0   : > { %1959 = vrot.lane.b32.xlu1 %v1958_v15, %s2116_s27  ;;  %v2401_v22 = vmax.f32 %v964_v19, 0.0 }
  0xf1   : > { %1954 = vrot.lane.b32.xlu0 %v1958_v15, %s2115_s18 }
  0xf2   : > { %v1988_v24 = vpack.i.bf16 %v2399_v21, %v2401_v22  ;;  %v2053_v9 = vpack.i.bf16 %v2401_v22, %v2399_v21 }
  0xf4   : > { %1969 = vrot.lane.b32.xlu1 %v1958_v15, %s2118_s29 }
  0xf5   : > { %1964 = vrot.lane.b32.xlu0 %v1958_v15, %s2117_s28 }
  0xf8   : > { %1984 = vrot.lane.b32.xlu1 %v1983_v20, %s2121_s15 }
  0xf9   : > { %1974 = vrot.lane.b32.xlu0 %v1983_v20, %s2119_s30 }
  0xfc   : > { %767 = vrot.lane.b32.xlu1 %v2383_v12, %s2122_s16 }
  0xfd   : > { %1979 = vrot.lane.b32.xlu0 %v1983_v20, %s2120_s14 }
 0x100   : > { %1989 = vrot.lane.b32.xlu1 %v1988_v24, %s2123_s17  ;;  %s2130_s17 = smov 114  }
 0x101   : > { %1999 = vrot.lane.b32.xlu0 %v1988_v24, %s2124_s19  ;;  %s2131_s19 = smov 2  }
 0x104   : > { %1994 = vrot.lane.b32.xlu1 %v1988_v24, %s2125_s20  ;;  %s2135_s20 = smov 98  }
 0x105   : > { %2009 = vrot.lane.b32.xlu0 %v1988_v24, %s2126_s21  ;;  %s2138_s21 = smov 96  }
 0x108   : > { %2004 = vrot.lane.b32.xlu1 %v1988_v24, %s2127_s22 }
 0x109   : > { %2019 = vrot.lane.b32.xlu0 %v1988_v24, %s2128_s23 }
 0x10c   : > { %2014 = vrot.lane.b32.xlu1 %v1988_v24, %s2116_s27  ;;  %s2132_s27 = smov 126  }
 0x10d   : > { %2029 = vrot.lane.b32.xlu0 %v1988_v24, %s2129_s24 }
 0x110   : > { %2024 = vrot.lane.b32.xlu1 %v1988_v24, %s2115_s18  ;;  %s2133_s18 = smov 97  }
 0x111   : > { %2039 = vrot.lane.b32.xlu0 %v1988_v24, %s2117_s28  ;;  %s2134_s28 = smov 110  }
 0x114   : > { %2034 = vrot.lane.b32.xlu1 %v1988_v24, %s2118_s29  ;;  %s2136_s29 = smov 95  }
 0x115   : > { %2054 = vrot.lane.b32.xlu0 %v2053_v9, %s2130_s17 }
 0x118   : > { %2044 = vrot.lane.b32.xlu1 %v1988_v24, %s2131_s19 }
 0x119   : > { %2064 = vrot.lane.b32.xlu0 %v2053_v9, %s2121_s15  ;;  %s2137_s15 = smov 94  }
 0x11c   : > { %2049 = vrot.lane.b32.xlu1 %v2053_v9, %s2119_s30 }
 0x11d   : > { %2074 = vrot.lane.b32.xlu0 %v2053_v9, %s2120_s14 }
 0x120   : > { %2059 = vrot.lane.b32.xlu1 %v2053_v9, %s2132_s27 }
 0x121   : > { %2084 = vrot.lane.b32.xlu0 %v2053_v9, %s2133_s18 }
 0x124   : > { %2069 = vrot.lane.b32.xlu1 %v2053_v9, %s2134_s28 }
 0x125   : > { %2094 = vrot.lane.b32.xlu0 %v2053_v9, %s2135_s20 }
 0x128   : > { %2079 = vrot.lane.b32.xlu1 %v2053_v9, %s2122_s16 }
 0x129   : > { %1656 = vrot.lane.b32.xlu0 %v2232_v4, %s2122_s16  ;;  %v2431_v4 = vpop.f32.mrb[1].mxu0 }
 0x12c   : > { %2089 = vrot.lane.b32.xlu1 %v2053_v9, %s2136_s29 }
 0x12d   : > { %1340 = vrot.lane.b32.xlu0 %v2399_v21, %s2137_s15 }
 0x130   : > { %2099 = vrot.lane.b32.xlu1 %v2053_v9, %s2138_s21  ;;  %s1916_s21 = smul.u32 80, %s3021_s26 }
 0x131   : > { %451 = vperm.xlu0 %1952, %v448_v27  }
 0x132   : > { %s2864_s17 = scalar_lea.vmem %s2892_s13, %s1916_s21 }
 0x134   : > { %1658 = vrot.lane.b32.xlu1 %v2236_v5, %s2122_s16  ;;  %v2443_v5 = vpop.permute.xlu0 %1640 }
 0x135   : > { %794 = vperm.xlu0 %1952, %v786_v28  }
 0x138   : > { %1342 = vrot.lane.b32.xlu1 %v2401_v22, %s2137_s15 }
 0x139   : > { %1676 = vperm.xlu0 %1952, %v1673_v30  }
 0x13c   : > { %789 = vperm.xlu1 %2103, %v785_v31  }
 0x140   : > { %1458 = vperm.xlu1 %2103, %v1455_v32  }
 0x15f   : > { %v2447_v34 = vpop.permute.xlu0 %765 }
 0x162   : > { %v1960_v35 = vpop.permute.xlu1 %1959 }
 0x163   : > { %v1962_v36 = vunpack.i.h.bf16 %v1960_v35  ;;  %v1961_v37 = vunpack.i.l.bf16 %v1960_v35  ;;  %v1955_v38 = vpop.permute.xlu0 %1954 }
 0x164   : > { %v1957_v39 = vunpack.i.h.bf16 %v1955_v38  ;;  %v1956_v40 = vunpack.i.l.bf16 %v1955_v38 }
 0x165   : > { %v659_v41 = vsel %vm2896_vm3, %v1962_v36, %v1961_v37  ;;  %v662_v42 = vsel %vm2896_vm3, %v1961_v37, %v1962_v36  ;;  %vm1872_vm3 = vmpackc.low %vm2901_vm4, %vm2321_vm8 }
 0x166   : > { %v629_v43 = vsel %vm2897_vm2, %v1957_v39, %v1956_v40  ;;  %v632_v44 = vsel %vm2897_vm2, %v1956_v40, %v1957_v39  ;;  %v1970_v45 = vpop.permute.xlu1 %1969  ;;  %vm1875_vm2 = vmpackc.low %vm2903_vm9, %vm2906_vm10 }
 0x167   : > { %v1868_v46 = vpack.c.bf16 %v659_v41, %v629_v43  ;;  %v1871_v47 = vpack.c.bf16 %v662_v42, %v632_v44  ;;  %v1972_v48 = vunpack.i.h.bf16 %v1970_v45  ;;  %v1971_v49 = vunpack.i.l.bf16 %v1970_v45  ;;  %v1965_v50 = vpop.permute.xlu0 %1964  ;;  %vm2490_vm4 = vmpackc.low %vm2907_vm14, %vm2363_vm1 }
 0x168   : > { %v1967_v51 = vunpack.i.h.bf16 %v1965_v50  ;;  %v1966_v52 = vunpack.i.l.bf16 %v1965_v50 }
 0x169   : > { %v699_v53 = vsel %vm2898_vm12, %v1972_v48, %v1971_v49  ;;  %v702_v54 = vsel %vm2898_vm12, %v1971_v49, %v1972_v48  ;;  %1870 = vmatprep.subr.msk.bf16.mxu0 %vm1869_vm15, %v1868_v46  ;;  %vm1878_vm12 = vmpackc.low %vm2905_vm6, %vm2333_vm11  ;;  %vm2904_vm15 = vcmask 916480  }
 0x16a   : > { %v675_v55 = vsel %vm2899_vm5, %v1967_v51, %v1966_v52  ;;  %v678_v57 = vsel %vm2899_vm5, %v1966_v52, %v1967_v51  ;;  %v1985_v58 = vpop.permute.xlu1 %1984  ;;  %1873 = vmatpush1.bf16.msk.msra.mxu0 %vm1872_vm3, %v1871_v47  ;;  %vm1881_vm3 = vmpackc.low %vm2906_vm10, %vm2139_vm0  ;;  %vm2909_vm5 = vcmp.ge.s32.totalorder %v2299_v16, 32  ;;  %v1648_v9 = vsel %vm2904_vm15, %v2445_v33, %v2443_v5 }
 0x16b   : > { %v1874_v60 = vpack.c.bf16 %v699_v53, %v675_v55  ;;  %v1877_v61 = vpack.c.bf16 %v702_v54, %v678_v57  ;;  %v1975_v62 = vpop.permute.xlu0 %1974  ;;  %v1987_v6 = vunpack.i.h.bf16 %v1985_v58  ;;  %v1986_v7 = vunpack.i.l.bf16 %v1985_v58  ;;  %v783_v58 = vld [vmem:[%s2884_s5] sm:$0xff] }
 0x16c   : > { %v1977_v63 = vunpack.i.h.bf16 %v1975_v62  ;;  %v1976_v3 = vunpack.i.l.bf16 %v1975_v62  ;;  %v2512_v40 = vsel %vm2904_vm15, %v2443_v5, %v2445_v33  ;;  %v2524_v44 = vsel %vm2907_vm14, %v1648_v9, -inf }
 0x16d   : > { %1876 = vmatprep.subr.msk.bf16.mxu0 %vm1875_vm2, %v1874_v60  ;;  %vm1884_vm2 = vmpackc.low %vm2902_vm7, %vm2139_vm0  ;;  %v758_v27 = vsel %vm2904_vm15, %v1987_v6, %v1986_v7  ;;  %vm2919_vm7 = vcmask 924672  }
 0x16e   : > { %v714_v8 = vsel %vm2900_vm13, %v1976_v3, %v1977_v63  ;;  %v718_v13 = vsel %vm2900_vm13, %v1977_v63, %v1976_v3  ;;  %v768_v14 = vpop.permute.xlu1 %767  ;;  %1879 = vmatpush1.bf16.msk.msra.mxu0 %vm1878_vm12, %v1877_v61  ;;  %vm2908_vm12 = vcmask 908288   ;;  %vm1003_vm13 = vcmask 269312   ;;  %vm2920_vm9 = vmmov %vm2919_vm7 }
 0x16f   : > { %v1880_v15 = vpack.c.bf16 %v718_v13, %v2383_v12  ;;  %v1883_v10 = vpack.c.bf16 %v714_v8, %v2381_v11  ;;  %v1980_v19 = vpop.permute.xlu0 %1979  ;;  %v754_v12 = vsel %vm2904_vm15, %v1986_v7, %v1987_v6  ;;  %v774_v33 = vsel %vm2908_vm12, %v768_v14, %v2447_v34 }
 0x170   : > { %v1982_v20 = vunpack.i.h.bf16 %v1980_v19  ;;  %v1981_v24 = vunpack.i.l.bf16 %v1980_v19  ;;  %vm1037_vm15 = vcmask 252928   ;;  %v770_v60 = vsel %vm2908_vm12, %v2447_v34, %v768_v14 }
 0x171   : > { %1882 = vmatprep.subr.msk.bf16.mxu0 %vm1881_vm3, %v1880_v15  ;;  %vm2502_vm3 = vmand %vm2909_vm5, %vm2905_vm6 }
 0x172   : > { %v730_v28 = vsel %vm2919_vm7, %v1981_v24, %v1982_v20  ;;  %v734_v30 = vsel %vm2920_vm9, %v1982_v20, %v1981_v24  ;;  %v1990_v32 = vpop.permute.xlu1 %1989  ;;  %1885 = vmatpush1.bf16.msk.msra.mxu0 %vm1884_vm2, %v1883_v10  ;;  %vm1890_vm7 = vmpackc.low %vm2139_vm0, %vm2905_vm6  ;;  %vm975_vm9 = vcmask 277504   ;;  %vm2910_vm0 = vcmp.ge.s32.totalorder %v2305_v18, 2  ;;  %v784_v20 = vld [vmem:[%s2884_s5 + $0x8] sm:$0xff] }
 0x173   : > { %v1886_v35 = vpack.c.bf16 %v758_v27, %v734_v30  ;;  %v1889_v36 = vpack.c.bf16 %v754_v12, %v730_v28  ;;  %v1992_v37 = vunpack.i.h.bf16 %v1990_v32  ;;  %v1991_v38 = vunpack.i.l.bf16 %v1990_v32  ;;  %v2000_v39 = vpop.permute.xlu0 %1999  ;;  %vm2518_vm2 = vmand %vm2907_vm14, %vm2906_vm10 }
 0x174   : > { %v2002_v41 = vunpack.i.h.bf16 %v2000_v39  ;;  %v2001_v42 = vunpack.i.l.bf16 %v2000_v39  ;;  %vm985_vm6 = vcmp.ge.s32.totalorder %v2311_v23, 2  ;;  %vm797_vm10 = vcmask 588800  }
 0x175   : > { %v1004_v45 = vsel %vm1003_vm13, %v1992_v37, %v1991_v38  ;;  %v1007_v5 = vsel %vm1003_vm13, %v1991_v38, %v1992_v37  ;;  %1888 = vmatprep.subr.msk.bf16.mxu0 %vm2490_vm4, %v1886_v35  ;;  %vm2925_vm14 = vcmp.ge.s32.totalorder %v2311_v23, 1  ;;  %vm2545_vm4 = vmand %vm2909_vm5, %vm2910_vm0  ;;  %vm2928_vm13 = vcmp.lt.s32.totalorder %v2305_v18, 15 }
 0x176   : > { %v1995_v46 = vpop.permute.xlu1 %1994  ;;  %1891 = vmatpush1.bf16.msk.msra.mxu0 %vm1890_vm7, %v1889_v36  ;;  %v1014_v47 = vsel %vm2502_vm3, %v1007_v5, 0.0  ;;  %v1015_v48 = vsel %vm2925_vm14, %v1004_v45, 0.0  ;;  %v976_v49 = vsel %vm975_vm9, %v2002_v41, %v2001_v42  ;;  %v979_v53 = vsel %vm975_vm9, %v2001_v42, %v2002_v41  ;;  %vm2559_vm14 = vmand %vm2909_vm5, %vm2928_vm13 }
 0x177   : > { %v1997_v50 = vunpack.i.h.bf16 %v1995_v46  ;;  %v2010_v51 = vpop.permute.xlu0 %2009  ;;  %1852 = vmatprep.subr.msk.mxu0 %vm2518_vm2, %v774_v33  ;;  %v1996_v54 = vunpack.i.l.bf16 %v1995_v46  ;;  %vm1079_vm3 = vcmask 146432   ;;  %vm1021_vm7 = vcmask 261120   ;;  %vm2931_vm12 = vmmov %vm2928_vm13 }
 0x178   : > { %v2012_v55 = vunpack.i.h.bf16 %v2010_v51  ;;  %v2011_v57 = vunpack.i.l.bf16 %v2010_v51  ;;  %vm1055_vm9 = vcmask 244736   ;;  %v1360_v62 = vrot.slane %v1014_v47, 4 }
 0x179   : > { %v1361_v63 = vrot.slane %v1015_v48, 4  ;;  %v1038_v3 = vsel %vm1037_vm15, %v1997_v50, %v1996_v54  ;;  %v1041_v6 = vsel %vm1037_vm15, %v1996_v54, %v1997_v50  ;;  %v996_v34 = vsel %vm2545_vm4, %v979_v53, 0.0 }
 0x17a   : > { %v2005_v7 = vpop.permute.xlu1 %2004  ;;  %1853 = vmatpush1.msk.msra.mxu0 %vm2931_vm12, %v770_v60  ;;  %vm2932_vm13 = vcmp.lt.s32.totalorder %v2311_v23, 15  ;;  %vm1062_vm5 = vcmp.lt.s32.totalorder %v2305_v18, 14  ;;  %v997_v14 = vsel %vm985_vm6, %v976_v49, 0.0  ;;  %v1048_v15 = vsel %vm2559_vm14, %v1041_v6, 0.0 }
 0x17b   : > { %v1049_v8 = vsel %vm2932_vm13, %v1038_v3, 0.0  ;;  %v2020_v13 = vpop.permute.xlu0 %2019  ;;  %1854 = vmatmul.mubr.msk.f32.vlgmr.msra.gmra.mrb[2].mxu0 %vm797_vm10, %v783_v58  ;;  %vm2933_vm15 = vcmp.ge.s32.totalorder %v2299_v16, 16  ;;  %v1083_v19 = vsel %vm1079_vm3, %v2011_v57, %v2012_v55  ;;  %vm1063_vm4 = vcmp.lt.s32.totalorder %v2311_v23, 14 }
 0x17c   : > { %vm2581_vm12 = vmand %vm2933_vm15, %vm2910_vm0  ;;  %874 = vmatprep.mubr.f32.mxu0 %v2113_v0  ;;  %vm1130_vm13 = vcmask 113664   ;;  %v1367_v24 = vrot.slane %v1049_v8, 4  ;;  %v1080_v9 = vsel %vm1079_vm3, %v2012_v55, %v2011_v57  ;;  %v2007_v11 = vunpack.i.h.bf16 %v2005_v7 }
 0x17d   : > { %v2006_v12 = vunpack.i.l.bf16 %v2005_v7  ;;  %v2022_v27 = vunpack.i.h.bf16 %v2020_v13  ;;  %v2021_v28 = vunpack.i.l.bf16 %v2020_v13  ;;  %vm2936_vm14 = vcmask 1043456  }
 0x17e   : > { %v2015_v30 = vpop.permute.xlu1 %2014  ;;  %v1407_v31 = vsel %vm2936_vm14, %v997_v14, %v1361_v63  ;;  %vm2937_vm15 = vmmov %vm2936_vm14  ;;  %v1366_v35 = vrot.slane %v1048_v15, 4  ;;  %v1090_v36 = vsel %vm2581_vm12, %v1083_v19, 0.0  ;;  %v2601_v41 = vsel %vm985_vm6, %v1080_v9, 0.0 }
 0x17f   : > { %v1406_v32 = vsel %vm2937_vm15, %v996_v34, %v1360_v62  ;;  %v1022_v37 = vsel %vm1021_vm7, %v2007_v11, %v2006_v12  ;;  %v1025_v38 = vsel %vm1021_vm7, %v2006_v12, %v2007_v11  ;;  %v2030_v39 = vpop.permute.xlu0 %2029  ;;  %1855 = vmatmul.mubr.msk.f32.gmra.mrb[4].mxu0 %vm797_vm10, %v784_v20  ;;  %vm2938_vm3 = vcmp.ge.s32.totalorder %v2299_v16, 32  ;;  %vm2942_vm10 = vmmov %vm2936_vm14 }
 0x180   : > { %v1030_v42 = vsel %vm2938_vm3, %v1025_v38, 0.0  ;;  %v2017_v45 = vunpack.i.h.bf16 %v2015_v30  ;;  %v2016_v5 = vunpack.i.l.bf16 %v2015_v30  ;;  %1752 = vmatprep.mubr.f32.mxu0 %v2113_v0  ;;  %vm2939_vm12 = vcmp.ge.s32.totalorder %v2299_v16, 16  ;;  %vm2943_vm15 = vmmov %vm2942_vm10 }
 0x181   : > { %vm2610_vm7 = vmand %vm2939_vm12, %vm1062_vm5  ;;  %v2032_v46 = vunpack.i.h.bf16 %v2030_v39  ;;  %v2031_v47 = vunpack.i.l.bf16 %v2030_v39  ;;  %v1409_v48 = vsel %vm2942_vm10, %v1022_v37, %v1367_v24  ;;  %v1408_v49 = vsel %vm2943_vm15, %v1030_v42, %v1366_v35 }
 0x182   : > { %v1059_v50 = vsel %vm1055_vm9, %v2021_v28, %v2022_v27  ;;  %vm2944_vm3 = vcmask 130048   ;;  %v1892_v52 = vpack.c.bf16 %v1409_v48, %v1407_v31  ;;  %v2025_v0 = vpop.permute.xlu1 %2024  ;;  %v1894_v53 = vpack.c.bf16 %v1408_v49, %v1406_v32 }
 0x183   : > { %v1111_v51 = vsel %vm2944_vm3, %v2016_v5, %v2017_v45  ;;  %vm2945_vm12 = vcmp.ge.s32.totalorder %v2299_v16, 32  ;;  %vm2948_vm14 = vmmov %vm2944_vm3  ;;  %vm2949_vm10 = vcmp.ge.s32.totalorder %v2299_v16, 16  ;;  %v1131_v58 = vsel %vm1130_vm13, %v2032_v46, %v2031_v47  ;;  %v2040_v61 = vpop.permute.xlu0 %2039 }
 0x184   : > { %vm2622_vm0 = vmand %vm2945_vm12, %vm1062_vm5  ;;  %v1108_v55 = vsel %vm2948_vm14, %v2017_v45, %v2016_v5  ;;  %v2629_v57 = vsel %vm2949_vm10, %v1111_v51, 0.0  ;;  %v1134_v60 = vsel %vm1130_vm13, %v2031_v47, %v2032_v46  ;;  %v1372_v62 = vrot.slane %v1090_v36, 4  ;;  %1893 = vmatprep.subr.bf16.mxu1 %v1892_v52 }
 0x185   : > { %v1373_v63 = vrot.slane %v2601_v41, 4  ;;  %v1141_v3 = vsel %vm2610_vm7, %v1134_v60, 0.0  ;;  %v2027_v6 = vunpack.i.h.bf16 %v2025_v0  ;;  %vm1148_vm15 = vcmask 15360   ;;  %1895 = vmatpush1.bf16.msra.mxu1 %v1894_v53 }
 0x186   : > { %v1056_v7 = vsel %vm1055_vm9, %v2022_v27, %v2021_v28  ;;  %v2639_v16 = vsel %vm1063_vm4, %v1131_v58, 0.0  ;;  %v2026_v34 = vunpack.i.l.bf16 %v2025_v0  ;;  %v2042_v8 = vunpack.i.h.bf16 %v2040_v61  ;;  %v2035_v19 = vpop.permute.xlu1 %2034 }
 0x187   : > { %v1072_v13 = vsel %vm2622_vm0, %v1059_v50, 0.0  ;;  %v1378_v14 = vrot.slane %v2629_v57, 4  ;;  %v1379_v15 = vrot.slane %v1108_v55, 4  ;;  %v2041_v10 = vunpack.i.l.bf16 %v2040_v61  ;;  %v2055_v12 = vpop.permute.xlu0 %2054 }
 0x188   : > { %v2644_v20 = vrot.slane %v1141_v3, 4  ;;  %vm2950_vm13 = vcmask 138240   ;;  %v2037_v9 = vunpack.i.h.bf16 %v2035_v19  ;;  %v2036_v11 = vunpack.i.l.bf16 %v2035_v19 }
 0x189   : > { %v1097_v24 = vsel %vm2950_vm13, %v2027_v6, %v2026_v34  ;;  %v1385_v27 = vrot.slane %v2639_v16, 4  ;;  %vm2951_vm9 = vmmov %vm2950_vm13  ;;  %v2057_v30 = vunpack.i.h.bf16 %v2055_v12  ;;  %v1073_v31 = vsel %vm1063_vm4, %v1056_v7, 0.0 }
 0x18a   : > { %v1100_v28 = vsel %vm2951_vm9, %v2026_v34, %v2027_v6  ;;  %vm2952_vm0 = vcmask 121856   ;;  %vm2953_vm14 = vcmask 7168   ;;  %v2056_v37 = vunpack.i.l.bf16 %v2055_v12  ;;  %v2045_v41 = vpop.permute.xlu1 %2044 }
 0x18b   : > { %v2652_v32 = vsel %vm2952_vm0, %v2041_v10, %v2042_v8  ;;  %v1164_v35 = vsel %vm2953_vm14, %v2037_v9, %v2036_v11  ;;  %vm2954_vm7 = vmmov %vm2953_vm14  ;;  %vm2955_vm3 = vcmp.ge.s32.totalorder %v2305_v18, 1  ;;  %vm2956_vm12 = vcmp.ge.s32.totalorder %v2311_v23, 1  ;;  %v2065_v49 = vpop.permute.xlu0 %2064 }
 0x18c   : > { %v1167_v36 = vsel %vm2954_vm7, %v2036_v11, %v2037_v9  ;;  %v2662_v39 = vsel %vm2956_vm12, %v1164_v35, 0.0  ;;  %vm2957_vm10 = vmmov %vm2956_vm12  ;;  %vm2958_vm13 = vcmask 1043456   ;;  %vm1185_vm9 = vcmask 1031168  }
 0x18d   : > { %v2658_v38 = vsel %vm2955_vm3, %v1167_v36, 0.0  ;;  %v1102_v42 = vsel %vm2957_vm10, %v1097_v24, 0.0  ;;  %v1410_v45 = vsel %vm2958_vm13, %v1072_v13, %v1372_v62  ;;  %v1101_v5 = vsel %vm2321_vm8, %v1100_v28, 0.0  ;;  %vm2964_vm8 = vmmov %vm2958_vm13 }
 0x18e   : > { %v1119_v33 = vsel %vm2952_vm0, %v2042_v8, %v2041_v10  ;;  %vm2959_vm14 = vcmp.lt.s32.totalorder %v2302_v17, 240  ;;  %vm2962_vm3 = vcmask 932864   ;;  %v1123_v25 = vsel %vm2333_vm11, %v2652_v32, 0.0  ;;  %vm2965_vm13 = vmmov %vm2964_vm8  ;;  %v2050_v61 = vpop.permute.xlu1 %2049 }
 0x18f   : > { %vm2674_vm7 = vmand %vm2959_vm14, %vm985_vm6  ;;  %v1202_v47 = vsel %vm2962_vm3, %v2056_v37, %v2057_v30  ;;  %v2047_v50 = vunpack.i.h.bf16 %v2045_v41  ;;  %v2046_v51 = vunpack.i.l.bf16 %v2045_v41  ;;  %v1411_v52 = vsel %vm2964_vm8, %v1073_v31, %v1373_v63  ;;  %v2075_v7 = vpop.permute.xlu0 %2074 }
 0x190   : > { %vm2963_vm12 = vmmov %vm2962_vm3  ;;  %vm1277_vm10 = vcmp.lt.s32.totalorder %v2302_v17, 224  ;;  %v1390_v0 = vrot.slane %v2658_v38, 4  ;;  %v1391_v53 = vrot.slane %v2662_v39, 4  ;;  %v1413_v54 = vsel %vm2965_vm13, %v1102_v42, %v1379_v15 }
 0x191   : > { %v1206_v48 = vsel %vm2963_vm12, %v2057_v30, %v2056_v37  ;;  %v2067_v55 = vunpack.i.h.bf16 %v2065_v49  ;;  %vm1292_vm0 = vcmask 793600   ;;  %vm2966_vm14 = vcmp.ge.s32.totalorder %v2305_v18, 2  ;;  %vm2967_vm11 = vmmov %vm2964_vm8 }
 0x192   : > { %v2690_v57 = vsel %vm2966_vm14, %v1202_v47, 0.0  ;;  %v1214_v29 = vsel %vm2674_vm7, %v1206_v48, 0.0  ;;  %v1896_v58 = vpack.c.bf16 %v1413_v54, %v1411_v52  ;;  %v2066_v60 = vunpack.i.l.bf16 %v2065_v49  ;;  %v2060_v30 = vpop.permute.xlu1 %2059 }
 0x193   : > { %v1149_v62 = vsel %vm1148_vm15, %v2047_v50, %v2046_v51  ;;  %v1412_v63 = vsel %vm2967_vm11, %v1101_v5, %v1378_v14  ;;  %v2052_v3 = vunpack.i.h.bf16 %v2050_v61  ;;  %v2051_v6 = vunpack.i.l.bf16 %v2050_v61  ;;  %v2085_v37 = vpop.permute.xlu0 %2084 }
 0x194   : > { %vm1252_vm3 = vcmask 900096   ;;  %v1152_v34 = vsel %vm1148_vm15, %v2046_v51, %v2047_v50  ;;  %1897 = vmatprep.subr.bf16.mxu1 %v1896_v58  ;;  %vm2968_vm12 = vcmask 916480   ;;  %v1898_v15 = vpack.c.bf16 %v1412_v63, %v1410_v45 }
 0x195   : > { %v2698_v8 = vsel %vm2968_vm12, %v2066_v60, %v2067_v55  ;;  %vm2969_vm8 = vmmov %vm2968_vm12  ;;  %vm2970_vm7 = vcmp.lt.s32.totalorder %v2302_v17, 240  ;;  %vm2971_vm13 = vcmask 1039360   ;;  %v2077_v24 = vunpack.i.h.bf16 %v2075_v7 }
 0x196   : > { %v1234_v13 = vsel %vm2969_vm8, %v2067_v55, %v2066_v60  ;;  %v1174_v19 = vsel %vm2971_vm13, %v2051_v6, %v2052_v3  ;;  %vm2972_vm14 = vmmov %vm2971_vm13  ;;  %vm1270_vm11 = vcmask 801792   ;;  %v1402_v9 = vrot.slane %v2690_v57, 4  ;;  %1899 = vmatpush1.bf16.msra.mxu1 %v1898_v15  ;;  %v2070_v52 = vpop.permute.xlu1 %2069 }
 0x197   : > { %v2703_v10 = vsel %vm2970_vm7, %v1234_v13, 0.0  ;;  %v1178_v14 = vsel %vm2972_vm14, %v2052_v3, %v2051_v6  ;;  %vm2973_vm15 = vcmp.lt.s32.totalorder %v2305_v18, 15  ;;  %vm2974_vm12 = vcmp.lt.s32.totalorder %v2311_v23, 15 }
 0x198   : > { %v1179_v11 = vsel %vm2973_vm15, %v1174_v19, 0.0  ;;  %v1180_v12 = vsel %vm2974_vm12, %v1178_v14, 0.0  ;;  %v2076_v28 = vunpack.i.l.bf16 %v2075_v7  ;;  %v1403_v31 = vrot.slane %v1214_v29, 4  ;;  %vm2976_vm7 = vmmov %vm2974_vm12  ;;  %v2095_v29 = vpop.permute.xlu0 %2094 }
 0x199   : > { %vm2975_vm8 = vcmp.ge.s32.totalorder %v2305_v18, 2  ;;  %v2062_v35 = vunpack.i.h.bf16 %v2060_v30  ;;  %v2061_v36 = vunpack.i.l.bf16 %v2060_v30  ;;  %v1424_v38 = vrot.slane %v2698_v8, 4 }
 0x19a   : > { %v1157_v32 = vsel %vm2975_vm8, %v1152_v34, 0.0  ;;  %v1425_v39 = vrot.slane %v2703_v10, 4  ;;  %v1124_v41 = vsel %vm2976_vm7, %v1119_v33, 0.0  ;;  %v1158_v42 = vsel %vm985_vm6, %v1149_v62, 0.0  ;;  %v2080_v13 = vpop.permute.xlu1 %2079 }
 0x19b   : > { %v1396_v45 = vrot.slane %v1179_v11, 4  ;;  %v1397_v5 = vrot.slane %v1180_v12, 4  ;;  %vm2977_vm13 = vcmask 924672   ;;  %v1186_v47 = vsel %vm1185_vm9, %v2061_v36, %v2062_v35 }
 0x19c   : > { %v1219_v46 = vsel %vm2977_vm13, %v2076_v28, %v2077_v24  ;;  %vm2978_vm14 = vcmask 1043456   ;;  %v2087_v50 = vunpack.i.h.bf16 %v2085_v37  ;;  %v2086_v51 = vunpack.i.l.bf16 %v2085_v37  ;;  %v1657_v61 = vpop.permute.xlu0 %1656 }
 0x19d   : > { %v1415_v48 = vsel %vm2978_vm14, %v1124_v41, %v1385_v27  ;;  %vm2979_vm15 = vmmov %vm2978_vm14  ;;  %vm2980_vm12 = vcmp.ge.s32.totalorder %v2311_v23, 1  ;;  %v2072_v27 = vunpack.i.h.bf16 %v2070_v52  ;;  %v2071_v62 = vunpack.i.l.bf16 %v2070_v52 }
 0x19e   : > { %v1417_v49 = vsel %vm2979_vm15, %v1158_v42, %v1391_v53  ;;  %vm2730_vm8 = vmand %vm1277_vm10, %vm2980_vm12  ;;  %v1293_v53 = vsel %vm1292_vm0, %v2086_v51, %v2087_v50  ;;  %v1297_v58 = vsel %vm1292_vm0, %v2087_v50, %v2086_v51  ;;  %vm2985_vm15 = vcmp.lt.s32.totalorder %v2302_v17, 240  ;;  %v1454_v17 = vld [vmem:[%s2888_s9] sm:$0xff] }
 0x19f   : > { %v1900_v54 = vpack.c.bf16 %v1417_v49, %v1415_v48  ;;  %vm2983_vm7 = vmmov %vm2978_vm14  ;;  %vm1326_vm14 = vcmask 777216   ;;  %v2096_v63 = vunpack.i.l.bf16 %v2095_v29  ;;  %v1190_v3 = vsel %vm1185_vm9, %v2062_v35, %v2061_v36 }
 0x1a0   : > { %v1414_v55 = vsel %vm2983_vm7, %v1123_v25, %v2644_v20  ;;  %vm2984_vm13 = vmmov %vm2983_vm7  ;;  %vm2988_vm7 = vcmask 924672   ;;  %v1195_v6 = vsel %vm1062_vm5, %v1186_v47, 0.0  ;;  %v1253_v7 = vsel %vm1252_vm3, %v2071_v62, %v2072_v27  ;;  %v2090_v47 = vpop.permute.xlu1 %2089 }
 0x1a1   : > { %v1416_v16 = vsel %vm2984_vm13, %v1157_v32, %v1390_v0  ;;  %vm2743_vm12 = vmand %vm2985_vm15, %vm1063_vm4  ;;  %v1223_v20 = vsel %vm2988_vm7, %v2077_v24, %v2076_v28  ;;  %vm2989_vm13 = vcmp.ge.s32.totalorder %v2305_v18, 1  ;;  %1901 = vmatprep.subr.bf16.mxu1 %v1900_v54  ;;  %v2097_v0 = vunpack.i.h.bf16 %v2095_v29 }
 0x1a2   : > { %v1902_v60 = vpack.c.bf16 %v1416_v16, %v1414_v55  ;;  %v1224_v25 = vsel %vm2989_vm13, %v1219_v46, 0.0  ;;  %v1257_v34 = vsel %vm1252_vm3, %v2072_v27, %v2071_v62  ;;  %vm1310_vm0 = vcmask 785408   ;;  %vm2990_vm15 = vmmov %vm2989_vm13 }
 0x1a3   : > { %v2757_v15 = vsel %vm2990_vm15, %v1293_v53, 0.0  ;;  %v1305_v19 = vsel %vm2730_vm8, %v1297_v58, 0.0  ;;  %v1264_v14 = vsel %vm1062_vm5, %v1253_v7, 0.0  ;;  %v1265_v24 = vsel %vm2743_vm12, %v1257_v34, 0.0 }
 0x1a4   : > { %1903 = vmatpush1.bf16.msra.mxu1 %v1902_v60  ;;  %v1430_v11 = vrot.slane %v1264_v14, 4  ;;  %v1271_v12 = vsel %vm1270_vm11, %v2096_v63, %v2097_v0  ;;  %v1275_v28 = vsel %vm1270_vm11, %v2097_v0, %v2096_v63  ;;  %v2082_v30 = vunpack.i.h.bf16 %v2080_v13  ;;  %v2100_v55 = vpop.permute.xlu1 %2099 }
 0x1a5   : > { %v1431_v32 = vrot.slane %v1265_v24, 4  ;;  %v2081_v35 = vunpack.i.l.bf16 %v2080_v13  ;;  %v1196_v36 = vsel %vm1063_vm4, %v1190_v3, 0.0  ;;  %vm2991_vm9 = vcmask 1043456  }
 0x1a6   : > { %v1419_v37 = vsel %vm2991_vm9, %v2401_v22, %v1397_v5  ;;  %vm2992_vm3 = vmmov %vm2991_vm9  ;;  %v1225_v48 = vsel %vm2363_vm1, %v1223_v20, 0.0  ;;  %vm2995_vm11 = vcmask 908288   ;;  %vm2997_vm13 = vcmp.lt.s32.totalorder %v2305_v18, 15 }
 0x1a7   : > { %v1421_v41 = vsel %vm2992_vm3, %v1196_v36, %v1403_v31  ;;  %vm2993_vm8 = vmmov %vm2992_vm3  ;;  %v1241_v49 = vsel %vm2995_vm11, %v2081_v35, %v2082_v30  ;;  %vm2998_vm15 = vcmp.lt.s32.totalorder %v2311_v23, 15  ;;  %v2092_v57 = vunpack.i.h.bf16 %v2090_v47 }
 0x1a8   : > { %v1418_v42 = vsel %vm2993_vm8, %v2399_v21, %v1396_v45  ;;  %vm2994_vm12 = vmmov %vm2992_vm3  ;;  %v1904_v51 = vpack.c.bf16 %v1421_v41, %v1419_v37  ;;  %v1246_v22 = vsel %vm2997_vm13, %v1241_v49, 0.0  ;;  %v2091_v56 = vunpack.i.l.bf16 %v2090_v47  ;;  %v1659_v7 = vpop.permute.xlu1 %1658 }
 0x1a9   : > { %v1420_v46 = vsel %vm2994_vm12, %v1195_v6, %v1402_v9  ;;  %vm2996_vm7 = vmmov %vm2995_vm11  ;;  %v2102_v29 = vunpack.i.h.bf16 %v2100_v55  ;;  %v2101_v53 = vunpack.i.l.bf16 %v2100_v55  ;;  %v1653_v58 = vcombine.low %v2512_v40, %v2524_v44 }
 0x1aa   : > { %v1245_v50 = vsel %vm2996_vm7, %v2082_v30, %v2081_v35  ;;  %v1906_v52 = vpack.c.bf16 %v1420_v46, %v1418_v42  ;;  %vm2787_vm9 = vmand %vm1277_vm10, %vm2998_vm15  ;;  %1905 = vmatprep.subr.bf16.mxu1 %v1904_v51  ;;  %v1327_v10 = vsel %vm1326_vm14, %v2091_v56, %v2092_v57  ;;  %v1437_v60 = vrot.slane %v1305_v19, 4  ;;  %v1341_v35 = vpop.permute.xlu0 %1340 }
 0x1ab   : > { %v1247_v9 = vsel %vm2518_vm2, %v1245_v50, 0.0  ;;  %vm3001_vm1 = vmmov %vm2992_vm3  ;;  %v1311_v63 = vsel %vm1310_vm0, %v2101_v53, %v2102_v29  ;;  %v1315_v3 = vsel %vm1310_vm0, %v2102_v29, %v2101_v53  ;;  %v1436_v6 = vrot.slane %v2757_v15, 4 }
 0x1ac   : > { %v1447_v31 = vsel %vm3001_vm1, %v1225_v48, %v1425_v39  ;;  %vm3002_vm3 = vmmov %vm3001_vm1  ;;  %1907 = vmatpush1.bf16.msra.mxu1 %v1906_v52  ;;  %v1331_v39 = vsel %vm1326_vm14, %v2092_v57, %v2091_v56  ;;  %vm1344_vm14 = vcmask 769024   ;;  %v1321_v40 = vsel %vm1277_vm10, %v1315_v3, 0.0  ;;  %v1343_v36 = vpop.permute.xlu1 %1342 }
 0x1ad   : > { %v1449_v45 = vsel %vm3002_vm3, %v1247_v9, %v1431_v32  ;;  %vm3003_vm8 = vmmov %vm3001_vm1  ;;  %v1339_v27 = vsel %vm2787_vm9, %v1331_v39, 0.0  ;;  %vm3010_vm15 = vcmask 908288   ;;  %v1345_v37 = vsel %vm1344_vm14, %v1341_v35, %v1343_v36 }
 0x1ae   : > { %v1446_v5 = vsel %vm3003_vm8, %v1224_v25, %v1424_v38  ;;  %vm3004_vm12 = vmmov %vm3001_vm1  ;;  %v1908_v16 = vpack.c.bf16 %v1449_v45, %v1447_v31  ;;  %v1443_v0 = vrot.slane %v1339_v27, 4  ;;  %v1660_v34 = vsel %vm3010_vm15, %v1657_v61, %v1659_v7 }
 0x1af   : > { %v1448_v54 = vsel %vm3004_vm12, %v1246_v22, %v1430_v11  ;;  %vm2805_vm11 = vmand %vm1277_vm10, %vm985_vm6  ;;  %vm3008_vm6 = vcmp.ge.s32.totalorder %v2305_v18, 2  ;;  %v1349_v41 = vsel %vm1344_vm14, %v1343_v36, %v1341_v35  ;;  %v1356_v23 = vsel %vm1062_vm5, %v1345_v37, 0.0 }
 0x1b0   : > { %v1910_v8 = vpack.c.bf16 %v1448_v54, %v1446_v5  ;;  %vm3007_vm7 = vmmov %vm2997_vm13  ;;  %1909 = vmatprep.subr.bf16.mxu1 %v1908_v16  ;;  %v1287_v20 = vsel %vm2805_vm11, %v1275_v28, 0.0  ;;  %v1286_v25 = vsel %vm3008_vm6, %v1271_v12, 0.0  ;;  %v1655_v28 = vmax.f32 %v1639_v2, %v1653_v58  ;;  %v452_v2 = vpop.permute.xlu0 %451 }
 0x1b1   : > { %v1338_v38 = vsel %vm3007_vm7, %v1327_v10, 0.0  ;;  %vm3009_vm13 = vmmov %vm3001_vm1  ;;  %v1451_v19 = vsel %vm3001_vm1, %v1287_v20, %v1437_v60  ;;  %vm1461_vm11 = vcmask 818176   ;;  %v532_v46 = vadd.f32 %v2421_v26, %v452_v2 }
 0x1b2   : > { %v1442_v62 = vrot.slane %v1338_v38, 4  ;;  %1911 = vmatpush1.bf16.msra.mxu1 %v1910_v8  ;;  %vm3011_vm9 = vmmov %vm3010_vm15  ;;  %v534_v47 = vadd.f32 %v2431_v4, %v452_v2  ;;  %vm3019_vm6 = vcmask 31744  }
 0x1b3   : > { %v1664_v13 = vsel %vm3011_vm9, %v1659_v7, %v1657_v61  ;;  %vm3012_vm3 = vmmov %vm3001_vm1  ;;  %v536_v18 = vmax.f32 %v532_v46, 0.0 }
 0x1b4   : > { %v1452_v44 = vsel %vm3009_vm13, %v1311_v63, %v1442_v62  ;;  %v1453_v14 = vsel %vm3012_vm3, %v1321_v40, %v1443_v0  ;;  %vm3013_vm0 = vmmov %vm3007_vm7  ;;  %v1666_v15 = vsel %vm2518_vm2, %v1664_v13, -inf  ;;  %v537_v48 = vmax.f32 %v534_v47, 0.0  ;;  %v795_v22 = vpop.permute.xlu0 %794 }
 0x1b5   : > { %v1665_v24 = vsel %vm3013_vm0, %v1660_v34, -inf  ;;  %v1912_v11 = vpack.c.bf16 %v1453_v14, %v1451_v19  ;;  %vm3014_vm8 = vmmov %vm3001_vm1  ;;  %1761 = vst [vmem:[%s2864_s17] sm:$0xff] %v536_v18 }
 0x1b6   : > { %v1450_v12 = vsel %vm3014_vm8, %v1286_v25, %v1436_v6  ;;  %v1669_v30 = vcombine.low %v1665_v24, %v1666_v15  ;;  %vm1351_vm12 = vmand %vm1277_vm10, %vm1063_vm4  ;;  %1762 = vst [vmem:[%s2864_s17 + $0x8] sm:$0xff] %v537_v48 }
 0x1b7   : > { %v1914_v32 = vpack.c.bf16 %v1452_v44, %v1450_v12  ;;  %1913 = vmatprep.subr.bf16.mxu1 %v1912_v11  ;;  %v1357_v42 = vsel %vm1351_vm12, %v1349_v41, 0.0  ;;  %vm3015_vm2 = vmmov %vm3001_vm1 }
 0x1b8   : > { %v1671_v43 = vmax.f32 %v1655_v28, %v1669_v30  ;;  %vm3016_vm4 = vmmov %vm3001_vm1  ;;  %v1677_v54 = vpop.permute.xlu0 %1676 }
 0x1b9   : > { %1915 = vmatpush1.bf16.msra.mxu1 %v1914_v32  ;;  %vm3017_vm10 = vmmov %vm3001_vm1 }
 0x1ba   : > { %1859 = vmatprep.subr.msk.mxu1 %vm3015_vm2, %v1357_v42  ;;  %v1680_v59 = vcombine.high %v1671_v43, %v1671_v43  ;;  %vm3018_vm7 = vmmov %vm3001_vm1 }
 0x1bb   : > { %v790_v49 = vpop.permute.xlu1 %789 }
 0x1bc   : > { %1862 = vmatprep.subr.msk.mxu0 %vm3017_vm10, %v1680_v59 }
 0x1bd   : > { %1860 = vmatpush1.msk.msra.mxu1 %vm3016_vm4, %v1356_v23  ;;  %1863 = vmatpush1.msk.msra.mxu0 %vm3018_vm7, %v1671_v43 }
 0x1be   : > { %1861 = vmatmul.mubr.msk.f32.vlgmr.msra.gmra.mrb[4].mxu1 %vm1461_vm11, %v1454_v17  ;;  %1864 = vmatmul.mubr.msk.f32.vlgmr.msra.gmra.mrb[6].mxu0 %vm3019_vm6, %v1672_v1 }
 0x1bf   : > { %v1459_v10 = vpop.permute.xlu1 %1458 }
 0x24e   : > { %v870_v26 = vpop.f32.mrb[2].mxu0 }
 0x24f   : > { %v872_v4 = vpop.f32.mrb[3].mxu0  ;;  %v871_v50 = vadd.f32 %v870_v26, %v790_v49 }
 0x250   : > { %v873_v51 = vadd.f32 %v872_v4, %v790_v49 }
 0x251   : > { %v881_v52 = vmax.f32 %v871_v50, 0.0 }
 0x252   : > { %v876_v21 = vpop.f32.mrb[4].mxu0  ;;  %v882_v57 = vmax.f32 %v873_v51, 0.0 }
 0x253   : > { %v877_v56 = vadd.f32 %v876_v21, %v795_v22  ;;  %v878_v9 = vpop.f32.mrb[5].mxu0  ;;  %1763 = vst [vmem:[%s2864_s17 + $0x10] sm:$0xff] %v881_v52 }
 0x254   : > { %v879_v31 = vadd.f32 %v878_v9, %v795_v22  ;;  %1764 = vst [vmem:[%s2864_s17 + $0x18] sm:$0xff] %v882_v57 }
 0x255   : > { %v883_v45 = vmax.f32 %v877_v56, 0.0 }
 0x256   : > { %v884_v5 = vmax.f32 %v879_v31, 0.0 }
 0x257   : > { %1765 = vst [vmem:[%s2864_s17 + $0x20] sm:$0xff] %v883_v45 }
 0x258   : > { %1766 = vst [vmem:[%s2864_s17 + $0x28] sm:$0xff] %v884_v5 }
 0x291   : > { %v1537_v33 = vpop.f32.mrb[4].mxu1  ;;  %v1754_v39 = vpop.f32.mrb[6].mxu0 }
 0x292   : > { %v1538_v55 = vadd.f32 %v1537_v33, %v1459_v10  ;;  %v1539_v16 = vpop.f32.mrb[5].mxu1  ;;  %v1755_v8 = vadd.f32 %v1754_v39, %v1677_v54  ;;  %v1756_v38 = vpop.f32.mrb[7].mxu0 }
 0x293   : > { %v1540_v27 = vadd.f32 %v1539_v16, %v1459_v10  ;;  %v1757_v29 = vadd.f32 %v1756_v38, %v1677_v54 }
 0x294   : > { %v1542_v53 = vmax.f32 %v1538_v55, 0.0  ;;  %v1759_v58 = vmax.f32 %v1755_v8, 0.0 }
 0x295   : > { %v1543_v60 = vmax.f32 %v1540_v27, 0.0  ;;  %v1760_v61 = vmax.f32 %v1757_v29, 0.0 }
 0x296   : > { %1767 = vst [vmem:[%s2864_s17 + $0x30] sm:$0xff] %v1542_v53  ;;  %1769 = vst [vmem:[%s2864_s17 + $0x40] sm:$0xff] %v1759_v58 }
 0x297   : > { %1768 = vst [vmem:[%s2864_s17 + $0x38] sm:$0xff] %v1543_v60  ;;  %1770 = vst [vmem:[%s2864_s17 + $0x48] sm:$0xff] %v1760_v61 }
 0x298 PF: > { %s23_s25 = sadd.s32 1, %s2111_s25  }
 0x299   : > { %p20_p4 = scmp.ge.s32.totalorder %s23_s25, 4  }
 0x29b   :  { %22 = sbr.rel (!%p20_p4) target bundleno = 1 (0x1), region = 102 }

</bundles_post_ra>
